<compile_context>
chip_gen: v7x
topology: tpu7x:2x2x1
jax: 0.10.0
libtpu: 0.0.40
codegen_flags: <defaults>
</compile_context>

<pallas_src>
import functools

import jax
import jax.numpy as jnp
from jax.experimental import pallas as pl
from jax.experimental.pallas import tpu as pltpu

ORDER = 2
NUM_SUPPORTS = 3  # (order * 3 + 1) * c_in  =>  3 supports


def _round_up(x, m):
    return ((x + m - 1) // m) * m


def gcn_kernel(x_ref, supp_ref, w_ref, b_ref, o_ref, hcat_ref, *, C, Lp, order,
               n_support):
    # x_ref:    (Bn, C*Lp, Vp)      rows = (c, l), lanes = v
    # supp_ref: (S, Vp, Vp)         adjacency matrices (right-multiplied)
    # w_ref:    (c_out, Kb*C)       squeezed 1x1-conv weight, Kb = order*S + 1
    # b_ref:    (c_out, 1)          f32 bias
    # o_ref:    (Bn, c_out, Lp*Vp)  lane-dense output block
    # hcat_ref: (Kb, Bn*C*Lp, Vp)   VMEM scratch holding every concat block
    Bn, CL, Vp = x_ref.shape
    LV = Lp * Vp
    dn2d = (((1,), (0,)), ((), ()))                    # (M,K)@(K,N) -> (M,N)

    # ---- graph propagation: each hop is one big 2-D MXU matmul ----------------
    x_rows = x_ref[...].reshape(Bn * CL, Vp)           # pure view (CL % 8 == 0)
    hcat_ref[0] = x_rows                               # identity concat block
    k = 1
    for s in range(n_support):
        a = supp_ref[s]                                # (Vp, Vp), stays resident
        rows = x_rows
        for _ in range(order):
            # x_{o+1}[b,c,w,l] = sum_v x_o[b,c,v,l] * A[v,w]
            rows = jax.lax.dot_general(rows, a, dn2d,
                                       preferred_element_type=rows.dtype)
            hcat_ref[k] = rows                         # plain store, no relayout
            k += 1

    # ---- deferred 1x1-conv mix: one K = Kb*C matmul per batch element ---------
    w = w_ref[...]                                     # (c_out, Kb*C), shared
    bias = b_ref[...]                                  # (c_out, 1) f32
    for b in range(Bn):
        hb = hcat_ref[:, b * CL:(b + 1) * CL, :]       # (Kb, C*Lp, Vp) static slice
        hb = hb.reshape(w.shape[1], LV)                # (Kb*C, Lp*Vp): the one relayout
        zb = jax.lax.dot_general(w, hb, dn2d,
                                 preferred_element_type=jnp.float32)
        o_ref[b] = (zb + bias).astype(o_ref.dtype)
    # TODO(synk): F.dropout is identity at inference (training=False); training-mode
    # dropout masking is not implemented.


def _pick_batch_tile(N, per_batch_bytes, fixed_bytes, vmem_cap):
    """Largest divisor of N whose working set fits ~45% of VMEM, preferring an
    even parallel grid extent >= 2 (v7x megacore / pipeline overlap)."""
    budget = int(0.45 * vmem_cap) - fixed_bytes
    max_fit = max(1, budget // per_batch_bytes)
    cap = N if N == 1 else max(1, N // 2)
    limit = min(max_fit, cap)
    divs = [d for d in range(1, N + 1) if N % d == 0 and d <= limit]
    if not divs:
        return 1
    even = [d for d in divs if (N // d) % 2 == 0]
    return max(even) if even else max(divs)


def gcn_forward(x, supports, weight, bias, *, order=ORDER, batch_tile=None,
                compute_dtype=jnp.bfloat16):
    """x: (N, C, V, L); supports: list of (V, V); weight: (c_out, (order*S+1)*C);
    bias: (c_out,).  Returns (N, c_out, V, L) in x.dtype."""
    N, C, V, L = x.shape
    S = len(supports)
    c_out, c_cat = weight.shape
    Kb = order * S + 1
    assert c_cat == Kb * C

    Vp = _round_up(V, 128)          # lane dim of every matmul / store
    Lp = _round_up(L, 8)            # keeps the (Bn, C*L, V) flatten a pure view
    CL = C * Lp
    LV = Lp * Vp
    cdt = jnp.dtype(compute_dtype)
    csz = cdt.itemsize

    # ---- layouts + zero padding (exact: padded rows/cols contribute zeros) ----
    xt = jnp.transpose(x, (0, 1, 3, 2))                          # (N, C, L, V)
    xt = jnp.pad(xt, ((0, 0), (0, 0), (0, Lp - L), (0, Vp - V)))
    x_rows = xt.reshape(N, CL, Vp).astype(cdt)                   # rows=(c,l), lanes=v
    supp = jnp.stack(supports, axis=0)
    supp = jnp.pad(supp, ((0, 0), (0, Vp - V), (0, Vp - V))).astype(cdt)
    w_cdt = weight.astype(cdt)                                   # (c_out, Kb*C)
    bias2d = bias.reshape(c_out, 1).astype(jnp.float32)

    # ---- VMEM-budgeted batch tile (128 MiB v5e/v6e, 64 MiB v7x) ----------------
    try:
        vmem_cap = int(pltpu.get_tpu_info().vmem_capacity_bytes)
    except Exception:
        vmem_cap = 64 * 1024 * 1024                              # conservative
    per_batch = csz * CL * Vp * 2            # x block, double-buffered
    per_batch += csz * Kb * CL * Vp          # concat scratch
    per_batch += csz * c_out * LV * 2        # output block, double-buffered
    fixed = csz * (S * Vp * Vp + c_out * c_cat) * 2 + 4 * c_out * 2
    if batch_tile is None:
        batch_tile = _pick_batch_tile(N, per_batch, fixed, vmem_cap)
    assert N % batch_tile == 0
    need = fixed + per_batch * batch_tile
    vmem_limit = int(min(vmem_cap - (2 << 20), max(need + (8 << 20), 32 << 20)))
    vmem_limit = max(vmem_limit, need + (1 << 20))

    kernel = functools.partial(gcn_kernel, C=C, Lp=Lp, order=order, n_support=S)

    flops = 2 * N * (S * order * CL * Vp * Vp          # propagation
                     + c_out * c_cat * LV)             # deferred 1x1-conv mix
    bytes_accessed = csz * (N * CL * Vp + N * c_out * LV
                            + S * Vp * Vp + c_out * c_cat) + 4 * c_out

    out3 = pl.pallas_call(
        kernel,
        out_shape=jax.ShapeDtypeStruct((N, c_out, LV), cdt),
        grid_spec=pltpu.PrefetchScalarGridSpec(
            num_scalar_prefetch=0,
            grid=(N // batch_tile,),
            in_specs=[
                pl.BlockSpec((batch_tile, CL, Vp), lambda n: (n, 0, 0)),
                pl.BlockSpec((S, Vp, Vp), lambda n: (0, 0, 0)),
                pl.BlockSpec((c_out, c_cat), lambda n: (0, 0)),
                pl.BlockSpec((c_out, 1), lambda n: (0, 0)),
            ],
            out_specs=pl.BlockSpec((batch_tile, c_out, LV), lambda n: (n, 0, 0)),
            scratch_shapes=[pltpu.VMEM((Kb, batch_tile * CL, Vp), cdt)],
        ),
        compiler_params=pltpu.CompilerParams(
            dimension_semantics=("parallel",),
            vmem_limit_bytes=int(vmem_limit)),
        cost_estimate=pl.CostEstimate(flops=int(flops), transcendentals=0,
                                      bytes_accessed=int(bytes_accessed)),
    )(x_rows, supp, w_cdt, bias2d)

    out = out3.reshape(N, c_out, Lp, Vp)[:, :, :L, :V]           # drop zero padding
    return jnp.transpose(out, (0, 1, 3, 2)).astype(x.dtype)      # -> (N, c_out, V, L)


def gcn_reference(x, supports, weight, bias, order=ORDER):
    """Pure-JAX reference matching the PyTorch forward."""
    out = [x]
    for a in supports:
        x1 = jnp.einsum('ncvl,vw->ncwl', x, a)
        out.append(x1)
        for _ in range(2, order + 1):
            x2 = jnp.einsum('ncvl,vw->ncwl', x1, a)
            out.append(x2)
            x1 = x2
    h = jnp.concatenate(out, axis=1)
    y = jnp.einsum('oi,nivl->novl', weight, h)
    return y + bias[None, :, None, None]


if __name__ == "__main__":
    key = jax.random.PRNGKey(0)
    k_x, k_s, k_w, k_b = jax.random.split(key, 4)

    N, C_IN, C_OUT, V, L = 2, 4, 8, 16, 16
    C_CAT = (ORDER * NUM_SUPPORTS + 1) * C_IN  # 28

    x = jax.random.normal(k_x, (N, C_IN, V, L), dtype=jnp.float32)
    support_keys = jax.random.split(k_s, NUM_SUPPORTS)
    supports = [
        jax.nn.softmax(jax.random.normal(sk, (V, V), dtype=jnp.float32), axis=-1)
        for sk in support_keys
    ]
    # Deterministic synthetic Conv2d(1x1) parameters (kernel dims squeezed).
    weight = jax.random.normal(k_w, (C_OUT, C_CAT), dtype=jnp.float32) * (1.0 / C_CAT ** 0.5)
    bias = jax.random.normal(k_b, (C_OUT,), dtype=jnp.float32) * 0.1

    ref = gcn_reference(x, supports, weight, bias)

    # Exact path: f32 MXU operands (tight tolerance).
    out_f32 = jax.block_until_ready(
        gcn_forward(x, supports, weight, bias, compute_dtype=jnp.float32))
    assert out_f32.shape == (N, C_OUT, V, L)
    assert jnp.allclose(out_f32, ref, rtol=2e-4, atol=2e-4), "f32 mismatch vs reference"

    # Multi-batch-per-step path (exercises the in-kernel per-batch mix loop).
    out_bt2 = jax.block_until_ready(
        gcn_forward(x, supports, weight, bias, batch_tile=2,
                    compute_dtype=jnp.float32))
    assert jnp.allclose(out_bt2, ref, rtol=2e-4, atol=2e-4), "batch_tile=2 mismatch"

    # Fast path: bf16 MXU operands with f32 mix accumulation (relaxed tolerance).
    out_bf16 = jax.block_until_ready(gcn_forward(x, supports, weight, bias))
    assert out_bf16.shape == (N, C_OUT, V, L)
    assert jnp.allclose(out_bf16, ref, rtol=5e-2, atol=5e-2), "bf16 mismatch vs reference"

    print("KERNEL_OK")
</pallas_src>

<mosaic_0001>
module attributes {stable_mosaic.version = 11 : i64} {
  func.func @gcn_kernel(%arg0: i32, %arg1: memref<1x64x128xf32, #tpu.memory_space<vmem>>, %arg2: memref<3x128x128xf32, #tpu.memory_space<vmem>>, %arg3: memref<8x28xf32, #tpu.memory_space<vmem>>, %arg4: memref<8x1xf32, #tpu.memory_space<vmem>>, %arg5: memref<1x8x2048xf32, #tpu.memory_space<vmem>>, %arg6: memref<7x64x128xf32, #tpu.memory_space<vmem>>) attributes {dimension_semantics = [#tpu.dimension_semantics<parallel>], iteration_bounds = array<i64: 2>, scalar_prefetch = 0 : i64, scratch_operands = 1 : i64, tpu.core_type = #tpu.core_type<tc>, window_params = [{transform_indices = @transform_0, window_bounds = array<i64: 1, 64, 128>}, {pipeline_mode = #tpu.pipeline_mode<synchronous>, transform_indices = @transform_1, window_bounds = array<i64: 3, 128, 128>}, {pipeline_mode = #tpu.pipeline_mode<synchronous>, transform_indices = @transform_2, window_bounds = array<i64: 8, 28>}, {pipeline_mode = #tpu.pipeline_mode<synchronous>, transform_indices = @transform_3, window_bounds = array<i64: 8, 1>}, {transform_indices = @transform_4, window_bounds = array<i64: 1, 8, 2048>}]} {
    %c0 = arith.constant 0 : index
    %c0_0 = arith.constant 0 : index
    %c0_1 = arith.constant 0 : index
    %0 = vector.load %arg1[%c0, %c0_0, %c0_1] : memref<1x64x128xf32, #tpu.memory_space<vmem>>, vector<1x64x128xf32>
    %1 = vector.shape_cast %0 : vector<1x64x128xf32> to vector<64x128xf32>
    %c0_2 = arith.constant 0 : index
    %c0_3 = arith.constant 0 : index
    %c0_4 = arith.constant 0 : index
    %2 = vector.load %arg6[%c0_2, %c0_3, %c0_4] : memref<7x64x128xf32, #tpu.memory_space<vmem>>, vector<1x64x128xf32>
    %3 = vector.shape_cast %2 : vector<1x64x128xf32> to vector<64x128xf32>
    %4 = vector.shape_cast %1 : vector<64x128xf32> to vector<1x64x128xf32>
    tpu.vector_store %arg6[%c0_2, %c0_3, %c0_4], %4 {strides = array<i32>} : memref<7x64x128xf32, #tpu.memory_space<vmem>>, vector<1x64x128xf32>,
    %c0_5 = arith.constant 0 : index
    %c0_6 = arith.constant 0 : index
    %c0_7 = arith.constant 0 : index
    %5 = vector.load %arg2[%c0_5, %c0_6, %c0_7] : memref<3x128x128xf32, #tpu.memory_space<vmem>>, vector<1x128x128xf32>
    %6 = vector.shape_cast %5 : vector<1x128x128xf32> to vector<128x128xf32>
    %cst = arith.constant dense<0.000000e+00> : vector<64x128xf32>
    %7 = tpu.matmul %1, %6, %cst {dimension_numbers = #tpu.dot_dimension_numbers<[1], [0], [0], [1], [0, 0, 1, 1], [], []>} : vector<64x128xf32>, vector<128x128xf32>, vector<64x128xf32> -> vector<64x128xf32>
    %c1 = arith.constant 1 : index
    %c0_8 = arith.constant 0 : index
    %c0_9 = arith.constant 0 : index
    %8 = vector.load %arg6[%c1, %c0_8, %c0_9] : memref<7x64x128xf32, #tpu.memory_space<vmem>>, vector<1x64x128xf32>
    %9 = vector.shape_cast %8 : vector<1x64x128xf32> to vector<64x128xf32>
    %10 = vector.shape_cast %7 : vector<64x128xf32> to vector<1x64x128xf32>
    tpu.vector_store %arg6[%c1, %c0_8, %c0_9], %10 {strides = array<i32>} : memref<7x64x128xf32, #tpu.memory_space<vmem>>, vector<1x64x128xf32>,
    %cst_10 = arith.constant dense<0.000000e+00> : vector<64x128xf32>
    %11 = tpu.matmul %7, %6, %cst_10 {dimension_numbers = #tpu.dot_dimension_numbers<[1], [0], [0], [1], [0, 0, 1, 1], [], []>} : vector<64x128xf32>, vector<128x128xf32>, vector<64x128xf32> -> vector<64x128xf32>
    %c2 = arith.constant 2 : index
    %c0_11 = arith.constant 0 : index
    %c0_12 = arith.constant 0 : index
    %12 = vector.load %arg6[%c2, %c0_11, %c0_12] : memref<7x64x128xf32, #tpu.memory_space<vmem>>, vector<1x64x128xf32>
    %13 = vector.shape_cast %12 : vector<1x64x128xf32> to vector<64x128xf32>
    %14 = vector.shape_cast %11 : vector<64x128xf32> to vector<1x64x128xf32>
    tpu.vector_store %arg6[%c2, %c0_11, %c0_12], %14 {strides = array<i32>} : memref<7x64x128xf32, #tpu.memory_space<vmem>>, vector<1x64x128xf32>,
    %c1_13 = arith.constant 1 : index
    %c0_14 = arith.constant 0 : index
    %c0_15 = arith.constant 0 : index
    %15 = vector.load %arg2[%c1_13, %c0_14, %c0_15] : memref<3x128x128xf32, #tpu.memory_space<vmem>>, vector<1x128x128xf32>
    %16 = vector.shape_cast %15 : vector<1x128x128xf32> to vector<128x128xf32>
    %cst_16 = arith.constant dense<0.000000e+00> : vector<64x128xf32>
    %17 = tpu.matmul %1, %16, %cst_16 {dimension_numbers = #tpu.dot_dimension_numbers<[1], [0], [0], [1], [0, 0, 1, 1], [], []>} : vector<64x128xf32>, vector<128x128xf32>, vector<64x128xf32> -> vector<64x128xf32>
    %c3 = arith.constant 3 : index
    %c0_17 = arith.constant 0 : index
    %c0_18 = arith.constant 0 : index
    %18 = vector.load %arg6[%c3, %c0_17, %c0_18] : memref<7x64x128xf32, #tpu.memory_space<vmem>>, vector<1x64x128xf32>
    %19 = vector.shape_cast %18 : vector<1x64x128xf32> to vector<64x128xf32>
    %20 = vector.shape_cast %17 : vector<64x128xf32> to vector<1x64x128xf32>
    tpu.vector_store %arg6[%c3, %c0_17, %c0_18], %20 {strides = array<i32>} : memref<7x64x128xf32, #tpu.memory_space<vmem>>, vector<1x64x128xf32>,
    %cst_19 = arith.constant dense<0.000000e+00> : vector<64x128xf32>
    %21 = tpu.matmul %17, %16, %cst_19 {dimension_numbers = #tpu.dot_dimension_numbers<[1], [0], [0], [1], [0, 0, 1, 1], [], []>} : vector<64x128xf32>, vector<128x128xf32>, vector<64x128xf32> -> vector<64x128xf32>
    %c4 = arith.constant 4 : index
    %c0_20 = arith.constant 0 : index
    %c0_21 = arith.constant 0 : index
    %22 = vector.load %arg6[%c4, %c0_20, %c0_21] : memref<7x64x128xf32, #tpu.memory_space<vmem>>, vector<1x64x128xf32>
    %23 = vector.shape_cast %22 : vector<1x64x128xf32> to vector<64x128xf32>
    %24 = vector.shape_cast %21 : vector<64x128xf32> to vector<1x64x128xf32>
    tpu.vector_store %arg6[%c4, %c0_20, %c0_21], %24 {strides = array<i32>} : memref<7x64x128xf32, #tpu.memory_space<vmem>>, vector<1x64x128xf32>,
    %c2_22 = arith.constant 2 : index
    %c0_23 = arith.constant 0 : index
    %c0_24 = arith.constant 0 : index
    %25 = vector.load %arg2[%c2_22, %c0_23, %c0_24] : memref<3x128x128xf32, #tpu.memory_space<vmem>>, vector<1x128x128xf32>
    %26 = vector.shape_cast %25 : vector<1x128x128xf32> to vector<128x128xf32>
    %cst_25 = arith.constant dense<0.000000e+00> : vector<64x128xf32>
    %27 = tpu.matmul %1, %26, %cst_25 {dimension_numbers = #tpu.dot_dimension_numbers<[1], [0], [0], [1], [0, 0, 1, 1], [], []>} : vector<64x128xf32>, vector<128x128xf32>, vector<64x128xf32> -> vector<64x128xf32>
    %c5 = arith.constant 5 : index
    %c0_26 = arith.constant 0 : index
    %c0_27 = arith.constant 0 : index
    %28 = vector.load %arg6[%c5, %c0_26, %c0_27] : memref<7x64x128xf32, #tpu.memory_space<vmem>>, vector<1x64x128xf32>
    %29 = vector.shape_cast %28 : vector<1x64x128xf32> to vector<64x128xf32>
    %30 = vector.shape_cast %27 : vector<64x128xf32> to vector<1x64x128xf32>
    tpu.vector_store %arg6[%c5, %c0_26, %c0_27], %30 {strides = array<i32>} : memref<7x64x128xf32, #tpu.memory_space<vmem>>, vector<1x64x128xf32>,
    %cst_28 = arith.constant dense<0.000000e+00> : vector<64x128xf32>
    %31 = tpu.matmul %27, %26, %cst_28 {dimension_numbers = #tpu.dot_dimension_numbers<[1], [0], [0], [1], [0, 0, 1, 1], [], []>} : vector<64x128xf32>, vector<128x128xf32>, vector<64x128xf32> -> vector<64x128xf32>
    %c6 = arith.constant 6 : index
    %c0_29 = arith.constant 0 : index
    %c0_30 = arith.constant 0 : index
    %32 = vector.load %arg6[%c6, %c0_29, %c0_30] : memref<7x64x128xf32, #tpu.memory_space<vmem>>, vector<1x64x128xf32>
    %33 = vector.shape_cast %32 : vector<1x64x128xf32> to vector<64x128xf32>
    %34 = vector.shape_cast %31 : vector<64x128xf32> to vector<1x64x128xf32>
    tpu.vector_store %arg6[%c6, %c0_29, %c0_30], %34 {strides = array<i32>} : memref<7x64x128xf32, #tpu.memory_space<vmem>>, vector<1x64x128xf32>,
    %c0_31 = arith.constant 0 : index
    %c0_32 = arith.constant 0 : index
    %35 = vector.load %arg3[%c0_31, %c0_32] : memref<8x28xf32, #tpu.memory_space<vmem>>, vector<8x28xf32>
    %c0_33 = arith.constant 0 : index
    %c0_34 = arith.constant 0 : index
    %36 = vector.load %arg4[%c0_33, %c0_34] : memref<8x1xf32, #tpu.memory_space<vmem>>, vector<8x1xf32>
    %c0_35 = arith.constant 0 : index
    %c0_36 = arith.constant 0 : index
    %c0_37 = arith.constant 0 : index
    %37 = vector.load %arg6[%c0_35, %c0_36, %c0_37] : memref<7x64x128xf32, #tpu.memory_space<vmem>>, vector<7x64x128xf32>
    %38 = vector.shape_cast %37 : vector<7x64x128xf32> to vector<28x2048xf32>
    %cst_38 = arith.constant dense<0.000000e+00> : vector<8x2048xf32>
    %39 = tpu.matmul %35, %38, %cst_38 {dimension_numbers = #tpu.dot_dimension_numbers<[1], [0], [0], [1], [0, 0, 1, 1], [], []>} : vector<8x28xf32>, vector<28x2048xf32>, vector<8x2048xf32> -> vector<8x2048xf32>
    %40 = vector.broadcast %36 : vector<8x1xf32> to vector<8x2048xf32>
    %41 = arith.addf %39, %40 : vector<8x2048xf32>
    %c0_39 = arith.constant 0 : index
    %c0_40 = arith.constant 0 : index
    %c0_41 = arith.constant 0 : index
    %42 = vector.load %arg5[%c0_39, %c0_40, %c0_41] : memref<1x8x2048xf32, #tpu.memory_space<vmem>>, vector<1x8x2048xf32>
    %43 = vector.shape_cast %42 : vector<1x8x2048xf32> to vector<8x2048xf32>
    %44 = vector.shape_cast %41 : vector<8x2048xf32> to vector<1x8x2048xf32>
    tpu.vector_store %arg5[%c0_39, %c0_40, %c0_41], %44 {strides = array<i32>} : memref<1x8x2048xf32, #tpu.memory_space<vmem>>, vector<1x8x2048xf32>,
    return
  }
  func.func @transform_0(%arg0: i32) -> (i32, i32, i32) {
    %c0_i32 = arith.constant 0 : i32
    %c0_i32_0 = arith.constant 0 : i32
    %c0_i32_1 = arith.constant 0 : i32
    return %arg0, %c0_i32, %c0_i32_0 : i32, i32, i32
  }
  func.func @transform_1(%arg0: i32) -> (i32, i32, i32) {
    %c0_i32 = arith.constant 0 : i32
    %c0_i32_0 = arith.constant 0 : i32
    %c0_i32_1 = arith.constant 0 : i32
    %c0_i32_2 = arith.constant 0 : i32
    return %c0_i32, %c0_i32_0, %c0_i32_1 : i32, i32, i32
  }
  func.func @transform_2(%arg0: i32) -> (i32, i32) {
    %c0_i32 = arith.constant 0 : i32
    %c0_i32_0 = arith.constant 0 : i32
    %c0_i32_1 = arith.constant 0 : i32
    return %c0_i32, %c0_i32_0 : i32, i32
  }
  func.func @transform_3(%arg0: i32) -> (i32, i32) {
    %c0_i32 = arith.constant 0 : i32
    %c0_i32_0 = arith.constant 0 : i32
    %c0_i32_1 = arith.constant 0 : i32
    return %c0_i32, %c0_i32_0 : i32, i32
  }
  func.func @transform_4(%arg0: i32) -> (i32, i32, i32) {
    %c0_i32 = arith.constant 0 : i32
    %c0_i32_0 = arith.constant 0 : i32
    %c0_i32_1 = arith.constant 0 : i32
    return %arg0, %c0_i32, %c0_i32_0 : i32, i32, i32
  }
}

</mosaic_0001>

<bundles_post_ra>
// kernel: tpu_custom_call.1
= control target key start
LH: loop header
LB: loop body
LE: loop exit
PB: predicated region body
PF: predicated region fallthrough
CT: control target
= control target key end

     0   :  { %9 = vsyncpa [#allocation4], 0  ;;  %s4732_s0 = inlined_call_operand.hbm [shape: f32[2,64,128], index: 0, kind: input, shape index: {}]   ;;  %s4733_s1 = inlined_call_operand.hbm [shape: f32[3,128,128], index: 1, kind: input, shape index: {}]   ;;  %s4734_s2 = inlined_call_operand.vmem [shape: f32[8,28], index: 2, kind: input, shape index: {}]   ;;  %s4735_s3 = inlined_call_operand.vmem [shape: f32[8,1], index: 3, kind: input, shape index: {}]   ;;  %s4736_s4 = inlined_call_operand.hbm [shape: f32[2,8,2048], index: 4, kind: output, shape index: {}]  }
   0x1   :  { %11 = vsyncpa [#allocation4 + $0x1], 0 }
   0x2   :  { %12 = vsyncpa [#allocation7], 0 }
   0x3   :  { %13 = vsyncpa [#allocation5], 0 }
   0x4   :  { %15 = vsyncpa [#allocation5 + $0x1], 0  ;;  %s3774_s15 = smov 0   ;;  %s3776_s16 = smov 0  }
   0x5   :  { %s3778_s17 = smov 0   ;;  %s3780_s18 = smov 0  }
   0x6 LB: > { %s3795_s19 = sadd.s32 4294967295, %s3738_s18   ;;  %s2816_s20 = sadd.s32 4294967294, %s3738_s18   ;;  %s3738_s18 = sphi %s3780_s18, %s4773_s18   ;;  %s3734_s17 = sphi %s3778_s17, %s4772_s17   ;;  %s3730_s16 = sphi %s3776_s16, %s4771_s16   ;;  %s3726_s15 = sphi %s3774_s15, %s4770_s15  }
   0x7   : > { %p41_p0 = scmp.ne.s32.totalorder %s3730_s16, %s3726_s15  ;;  %p4737_p1 = scmp.eq.s32.totalorder %s3795_s19, 0 }
   0x8   : > { %p134_p3 = scmp.eq.s32.totalorder %s2816_s20, 1  ;;  %p2817_p5 = scmp.ge.s32.totalorder %s3738_s18, 1 }
   0x9   : > { %p3804_p4 = por %p4737_p1, %p41_p0  ;;  %p141_p7 = scmp.lt.s32.totalorder %s3738_s18, 3 }
   0xa   : > { %p3809_p6 = por %p134_p3, %p41_p0  ;;  %s3740_s24 = smov [#allocation6]  }
   0xb   : > { %s4742_s21 = scalar_select %p3804_p4, 1, 0 }
   0xc   : > { %s4743_s22 = scalar_select %p3809_p6, 1, 0 }
   0xd   : > { %p3814_p8 = pnand %p2817_p5, %p141_p7  ;;  %s153_s25 = sshll.u32 %s3740_s24, 4  ;;  %s3818_s25 = int_to_ptr.vmem [resolvable:$true] %s153_s25 }
   0xe   : > { %s3830_s27 = sadd.s32 1, %s3738_s18   ;;  %s28_s28 = sadd.s32 1, %s3734_s17 }
   0xf   : > { %s4744_s23 = scalar_select %p3814_p8, 1, 0 }
  0x10   : > { %p3546_p9 = pneg %p3814_p8  ;;  %s25_s29 = ssub.s32 %s3738_s18, %s3830_s27 }
  0x11   : > { %s3610_s6 = scalar_lea.hbm %s4733_s1, 6144 }
  0x12   : > { %p3825_p11 = pnand %p3546_p9, %p4737_p1  ;;  %p3611_p12 = scmp.ne.s32.totalorder %s4733_s1, %s3610_s6 }
  0x13   : > { %p3617_p5 = scmp.lt.u32.totalorder %s3610_s6, %s4733_s1 }
  0x14   : > { %p3612_p13 = pneg %p3825_p11 }
  0x16   : > { %p3613_p0 = pnand %p3612_p13, %p3611_p12 }
  0x18   : > { %p3614_p3 = pneg %p3613_p0 }
  0x1a   : > { %p3619_p7 = pnand %p3617_p5, %p3614_p3 }
  0x1c   : > { %3622 = shalt.err (!%p3619_p7)
}
  0x1d   : > { %s3623_s11 = scalar_lea.vmem %s3818_s25, 6144  ;;  %p3631_p2 = scmp.lt.s32.totalorder %s3818_s25, %s3818_s25 }
  0x1e   : > { %p3624_p9 = scmp.ne.s32.totalorder %s3818_s25, %s3623_s11  ;;  %p3632_p6 = scmp.lt.s32.totalorder %s3623_s11, %s3623_s11 }
  0x20   : > { %p3626_p10 = pnand %p3624_p9, %p3612_p13  ;;  %p3633_p4 = por %p3632_p6, %p3631_p2 }
  0x22   : > { %p3627_p1 = pneg %p3626_p10 }
  0x24   : > { %p3634_p8 = pnand %p3633_p4, %p3627_p1 }
  0x26   : > { %3637 = shalt.err (!%p3634_p8)
}
  0x27   : > { %s3741_s12 = smov 128   ;;  %s3742_s13 = smov 8  }
  0x28   : > { %3549 = dma.hbm_to_vmem [thread:$0]  (!%p3825_p11), %s4733_s1, 6144, %s3818_s25, [#allocation7], %s3741_s12, %s3741_s12, %s3742_s13  }
  0x29   : > { %p26_p1 = scmp.eq.s32.totalorder %s25_s29, 0  ;;  %p35_p2 = scmp.ne.s32.totalorder %s3734_s17, %s3730_s16 }
  0x2a   : > { %p36_p4 = scmp.eq.s32.totalorder %s3738_s18, 0  ;;  %p3559_p6 = scmp.lt.s32.totalorder %s3738_s18, 2 }
  0x2b   : > { %s3864_s24 = scalar_select %p26_p1, %s3734_s17, %s28_s28  }
  0x2c   : > { %p37_p8 = por %p36_p4, %p35_p2  ;;  %p4746_p10 = scmp.eq.s32.totalorder %s3795_s19, 1 }
  0x2d   : > { %s173_s26 = sand.u32 1, %s3734_s17   ;;  %s2856_s5 = sshll.u32 %s3738_s18, 10 }
  0x2e   : > { %p3868_p12 = por %p4746_p10, %p35_p2  ;;  %s2820_s6 = sshll.u32 %s173_s26, 6 }
  0x2f   : > { %s3877_s9 = scalar_lea.hbm %s4732_s0, %s2856_s5  ;;  %s177_s25 = scalar_lea.vmem [#allocation3], %s2820_s6 }
  0x30   : > { %s184_s28 = sshll.u32 %s177_s25, 4  ;;  %p3879_p11 = pnand %p3559_p6, %p37_p8  ;;  %s3883_s28 = int_to_ptr.vmem [resolvable:$true] %s184_s28 }
  0x31   : > { %s3885_s10 = scalar_lea.sflag [#allocation4], %s173_s26  ;;  %s3638_s11 = scalar_lea.hbm %s3877_s9, 1024 }
  0x32   : > { %p3639_p13 = scmp.ne.s32.totalorder %s3877_s9, %s3638_s11  ;;  %p3640_p0 = pneg %p3879_p11 }
  0x33   : > { %s3643_s5 = scalar_lea.hbm %s4732_s0, 2048  ;;  %p3644_p7 = scmp.lt.u32.totalorder %s3877_s9, %s4732_s0 }
  0x34   : > { %p3641_p3 = pnand %p3640_p0, %p3639_p13  ;;  %p3645_p9 = scmp.lt.u32.totalorder %s3643_s5, %s3638_s11 }
  0x35   : > { %p3647_p2 = scmp.lt.u32.totalorder %s3638_s11, %s3877_s9 }
  0x36   : > { %p3642_p5 = pneg %p3641_p3  ;;  %p3646_p1 = por %p3645_p9, %p3644_p7 }
  0x38   : > { %p3648_p4 = por %p3647_p2, %p3646_p1 }
  0x3a   : > { %p3649_p6 = pnand %p3648_p4, %p3642_p5 }
  0x3c   : > { %3652 = shalt.err (!%p3649_p6)
}
  0x3d   : > { %s3653_s26 = scalar_lea.vmem %s3883_s28, 1024  ;;  %s3743_s8 = smov [#allocation3]  }
  0x3e   : > { %p3654_p8 = scmp.ne.s32.totalorder %s3883_s28, %s3653_s26  ;;  %s3658_s25 = sshll.u32 %s3743_s8, 4  ;;  %s3659_s25 = int_to_ptr.vmem [resolvable:$false] %s3658_s25 }
  0x3f   : > { %s3660_s14 = scalar_lea.vmem %s3659_s25, 2048  ;;  %p3661_p3 = scmp.lt.s32.totalorder %s3883_s28, %s3659_s25 }
  0x40   : > { %p3656_p10 = pnand %p3654_p8, %p3640_p0  ;;  %p3662_p7 = scmp.lt.s32.totalorder %s3660_s14, %s3653_s26 }
  0x42   : > { %p3657_p13 = pneg %p3656_p10  ;;  %p3663_p9 = por %p3662_p7, %p3661_p3 }
  0x44   : > { %p3664_p1 = pnand %p3663_p9, %p3657_p13 }
  0x46   : > { %3667 = shalt.err (!%p3664_p1)
}
  0x47   : > { %3553 = dma.hbm_to_vmem [thread:$0]  (!%p3879_p11), %s3877_s9, 1024, %s3883_s28, %s3885_s10, %s3741_s12, %s3741_s12, %s3742_s13  }
  0x48   : > { %p4749_p0 = scmp.ne.s32.totalorder %s4744_s23, 0 }
  0x49   : > { %s3919_s11 = sand.u32 (!%p4749_p0), 1, %s3730_s16   ;;  %p4750_p5 = scmp.ne.s32.totalorder (!%p4749_p0), %s4742_s21, 0 }
  0x4a   : > { %196 = sbr.rel (%p4749_p0) target bundleno = 893 (0x37d), region = 36  ;;  %s2824_s20 = sshll.u32 (!%p4749_p0), %s3919_s11, 6 }
  0x4b   : > { %s199_s5 = scalar_lea.sflag (!%p4749_p0), [#allocation4], %s3919_s11  ;;  %s3923_s6 = scalar_lea.vmem (!%p4749_p0), [#allocation3], %s2824_s20 }
  0x51   : > { %3713 = dma.done.wait (%p4750_p5), %s199_s5, 1024  }
  0x52   : > { %3715 = vsyncadd (%p4750_p5), %s199_s5, 4294966272  ;;  %p4751_p11 = scmp.eq.s32.totalorder %s3795_s19, 0 }
  0x54   : > { %3717 = dma.done.wait (%p4751_p11), [#allocation7], 6144   ;;  %p4752_p2 = pmov %p4751_p11 }
  0x55   : > { %v247_v0 = vld [vmem:[#allocation6] sm:$0xff]  ;;  %v248_v1 = vld [vmem:[#allocation6 + $0x8] sm:$0xff]  ;;  %v249_v2 = vld [vmem:[#allocation6 + $0x10] sm:$0xff]  ;;  %vm2104_vm0 = vcmask 1043456   ;;  %vm3747_vm1 = vmmov 1   ;;  %vm2100_vm3 = vcmask 228352  }
  0x56   : > { %3719 = vsyncadd (%p4752_p2), [#allocation7], 4294961152  ;;  %v3266_v3 = vpack.c.bf16 %v248_v1, %v247_v0  ;;  %v250_v4 = vld [vmem:[#allocation6 + $0x18] sm:$0xff]  ;;  %v251_v6 = vld [vmem:[#allocation6 + $0x20] sm:$0xff]  ;;  %s2826_s9 = sshll.u32 %s3919_s11, 7  ;;  %s2857_s29 = sshll.u32 %s3795_s19, 11 }
  0x57   : > { %v3270_v5 = vpack.c.bf16 %v250_v4, %v249_v2  ;;  %v252_v7 = vld [vmem:[#allocation6 + $0x28] sm:$0xff]  ;;  %v3934_v9 = vld [vmem:[%s3923_s6] sm:$0xff]  ;;  %v253_v10 = vld [vmem:[#allocation6 + $0x30] sm:$0xff]  ;;  %s4665_s28 = scalar_lea.vmem [#allocation8], %s2826_s9  ;;  %s4686_s8 = scalar_lea.hbm %s4736_s4, %s2857_s29 }
  0x58   : > { %3267 = vmatprep.subr.bf16.mxu0 %v3266_v3  ;;  %3299 = vmatprep.subr.bf16.mxu1 %v3266_v3  ;;  %v3274_v8 = vpack.c.bf16 %v252_v7, %v251_v6  ;;  %v254_v11 = vld [vmem:[#allocation6 + $0x38] sm:$0xff]  ;;  %v255_v13 = vld [vmem:[#allocation6 + $0x40] sm:$0xff]  ;;  %v256_v14 = vld [vmem:[#allocation6 + $0x48] sm:$0xff]  ;;  %s2736_s10 = sshll.u32 %s4665_s28, 4  ;;  %s2722_s19 = scalar_lea.sflag [#allocation5], %s3919_s11  ;;  %s4688_s10 = int_to_ptr.vmem [resolvable:$true] %s2736_s10 }
  0x59   : > { %3269 = vmatpush3.bf16.msra.mxu0 %v3266_v3  ;;  %3301 = vmatpush3.bf16.msra.mxu1 %v3266_v3  ;;  %v3278_v12 = vpack.c.bf16 %v254_v11, %v253_v10  ;;  %v3282_v15 = vpack.c.bf16 %v256_v14, %v255_v13  ;;  %v257_v16 = vld [vmem:[#allocation6 + $0x50] sm:$0xff]  ;;  %v258_v17 = vld [vmem:[#allocation6 + $0x58] sm:$0xff]  ;;  %v259_v19 = vld [vmem:[#allocation6 + $0x60] sm:$0xff]  ;;  %s3668_s25 = scalar_lea.vmem %s4688_s10, 2048  ;;  %s3748_s14 = smov [#allocation8]  }
  0x5a   : > { %3271 = vmatprep.subr.bf16.mxu0 %v3270_v5  ;;  %3303 = vmatprep.subr.bf16.mxu1 %v3270_v5  ;;  %v3286_v18 = vpack.c.bf16 %v258_v17, %v257_v16  ;;  %v260_v20 = vld [vmem:[#allocation6 + $0x68] sm:$0xff]  ;;  %v261_v22 = vld [vmem:[#allocation6 + $0x70] sm:$0xff]  ;;  %v262_v23 = vld [vmem:[#allocation6 + $0x78] sm:$0xff]  ;;  %p3669_p4 = scmp.ne.s32.totalorder %s4688_s10, %s3668_s25  ;;  %s3672_s20 = sshll.u32 %s3748_s14, 4  ;;  %s3673_s20 = int_to_ptr.vmem [resolvable:$false] %s3672_s20 }
  0x5b   : > { %3034 = vmatprep.mubr.f32.mxu0 %v3934_v9  ;;  %v3290_v21 = vpack.c.bf16 %v260_v20, %v259_v19  ;;  %v3294_v24 = vpack.c.bf16 %v262_v23, %v261_v22  ;;  %v492_v25 = vld [vmem:[#allocation6 + $0x80] sm:$0xff]  ;;  %v493_v26 = vld [vmem:[#allocation6 + $0x88] sm:$0xff]  ;;  %v494_v28 = vld [vmem:[#allocation6 + $0x90] sm:$0xff]  ;;  %v3744_v19 = vmov 1966171168   ;;  %s3674_s5 = scalar_lea.vmem %s3673_s20, 4096  ;;  %p3675_p10 = scmp.lt.s32.totalorder %s4688_s10, %s3673_s20 }
  0x5c   : > { %v3937_v27 = vpack.c.bf16 %v493_v26, %v492_v25  ;;  %v495_v29 = vld [vmem:[#allocation6 + $0x98] sm:$0xff]  ;;  %v3940_v30 = vld [vmem:[%s3923_s6 + $0x8] sm:$0xff]  ;;  %v3944_v31 = vld [vmem:[%s3923_s6 + $0x10] sm:$0xff]  ;;  %v1109_v20 = vunpack.c.l.s4 %v3744_v19  ;;  %p3670_p6 = pnand %p3669_p4, %p3868_p12  ;;  %p3676_p13 = scmp.lt.s32.totalorder %s3674_s5, %s3668_s25 }
  0x5d   : > { %3273 = vmatpush3.bf16.msra.mxu0 %v3270_v5  ;;  %3305 = vmatpush3.bf16.msra.mxu1 %v3270_v5  ;;  %v3946_v32 = vpack.c.bf16 %v495_v29, %v494_v28  ;;  %v496_v33 = vld [vmem:[#allocation6 + $0xa0] sm:$0xff]  ;;  %v497_v34 = vld [vmem:[#allocation6 + $0xa8] sm:$0xff]  ;;  %v3953_v35 = vld [vmem:[%s3923_s6 + $0x18] sm:$0xff] }
  0x5e   : > { %3275 = vmatprep.subr.bf16.mxu0 %v3274_v8  ;;  %3307 = vmatprep.subr.bf16.mxu1 %v3274_v8  ;;  %v3957_v36 = vld [vmem:[%s3923_s6 + $0x20] sm:$0xff]  ;;  %v3959_v37 = vpack.c.bf16 %v497_v34, %v496_v33  ;;  %v498_v38 = vld [vmem:[#allocation6 + $0xb0] sm:$0xff]  ;;  %v499_v39 = vld [vmem:[#allocation6 + $0xb8] sm:$0xff]  ;;  %v1110_v29 = vunpack.c.0.s8 %v1109_v20  ;;  %p3671_p8 = pneg %p3670_p6  ;;  %p3677_p3 = por %p3676_p13, %p3675_p10 }
  0x5f   : > { %v3965_v40 = vld [vmem:[%s3923_s6 + $0x28] sm:$0xff]  ;;  %v3969_v41 = vld [vmem:[%s3923_s6 + $0x30] sm:$0xff]  ;;  %v3971_v42 = vpack.c.bf16 %v499_v39, %v498_v38  ;;  %v500_v43 = vld [vmem:[#allocation6 + $0xc0] sm:$0xff] }
  0x60   : > { %v501_v44 = vld [vmem:[#allocation6 + $0xc8] sm:$0xff]  ;;  %v3977_v45 = vld [vmem:[%s3923_s6 + $0x38] sm:$0xff]  ;;  %v502_v47 = vld [vmem:[#allocation6 + $0xd0] sm:$0xff]  ;;  %p3678_p7 = pnand %p3677_p3, %p3671_p8 }
  0x61   : > { %3277 = vmatpush3.bf16.msra.mxu0 %v3274_v8  ;;  %3309 = vmatpush3.bf16.msra.mxu1 %v3274_v8  ;;  %v3980_v46 = vpack.c.bf16 %v501_v44, %v500_v43  ;;  %v503_v48 = vld [vmem:[#allocation6 + $0xd8] sm:$0xff]  ;;  %v504_v50 = vld [vmem:[#allocation6 + $0xe0] sm:$0xff]  ;;  %v505_v51 = vld [vmem:[#allocation6 + $0xe8] sm:$0xff] }
  0x62   : > { %3279 = vmatprep.subr.bf16.mxu0 %v3278_v12  ;;  %3311 = vmatprep.subr.bf16.mxu1 %v3278_v12  ;;  %v3986_v49 = vpack.c.bf16 %v503_v48, %v502_v47  ;;  %v3990_v52 = vpack.c.bf16 %v505_v51, %v504_v50  ;;  %v506_v53 = vld [vmem:[#allocation6 + $0xf0] sm:$0xff]  ;;  %v507_v54 = vld [vmem:[#allocation6 + $0xf8] sm:$0xff]  ;;  %v737_v56 = vld [vmem:[#allocation6 + $0x100] sm:$0xff] }
  0x63   : > { %v3994_v55 = vpack.c.bf16 %v507_v54, %v506_v53  ;;  %v738_v57 = vld [vmem:[#allocation6 + $0x108] sm:$0xff]  ;;  %v739_v59 = vld [vmem:[#allocation6 + $0x110] sm:$0xff]  ;;  %v740_v60 = vld [vmem:[#allocation6 + $0x118] sm:$0xff] }
  0x64   : > { %v3998_v58 = vpack.c.bf16 %v738_v57, %v737_v56  ;;  %v4002_v61 = vpack.c.bf16 %v740_v60, %v739_v59  ;;  %v741_v62 = vld [vmem:[#allocation6 + $0x120] sm:$0xff]  ;;  %v742_v63 = vld [vmem:[#allocation6 + $0x128] sm:$0xff]  ;;  %v743_v1 = vld [vmem:[#allocation6 + $0x130] sm:$0xff] }
  0x65   : > { %3281 = vmatpush3.bf16.msra.mxu0 %v3278_v12  ;;  %3313 = vmatpush3.bf16.msra.mxu1 %v3278_v12  ;;  %v4008_v0 = vpack.c.bf16 %v742_v63, %v741_v62  ;;  %v744_v2 = vld [vmem:[#allocation6 + $0x138] sm:$0xff]  ;;  %v745_v4 = vld [vmem:[#allocation6 + $0x140] sm:$0xff]  ;;  %v746_v5 = vld [vmem:[#allocation6 + $0x148] sm:$0xff] }
  0x66   : > { %3283 = vmatprep.subr.bf16.mxu0 %v3282_v15  ;;  %3315 = vmatprep.subr.bf16.mxu1 %v3282_v15  ;;  %v4014_v3 = vpack.c.bf16 %v744_v2, %v743_v1  ;;  %v4020_v6 = vpack.c.bf16 %v746_v5, %v745_v4  ;;  %v747_v7 = vld [vmem:[#allocation6 + $0x150] sm:$0xff]  ;;  %v748_v8 = vld [vmem:[#allocation6 + $0x158] sm:$0xff]  ;;  %v749_v11 = vld [vmem:[#allocation6 + $0x160] sm:$0xff] }
  0x67   : > { %v4026_v10 = vpack.c.bf16 %v748_v8, %v747_v7  ;;  %v750_v12 = vld [vmem:[#allocation6 + $0x168] sm:$0xff]  ;;  %v751_v14 = vld [vmem:[#allocation6 + $0x170] sm:$0xff]  ;;  %vm4565_vm2 = vmpackc.low %vm2104_vm0, %vm3747_vm1 }
  0x68   : > { %v4030_v13 = vpack.c.bf16 %v750_v12, %v749_v11 }
  0x69   : > { %3285 = vmatpush3.bf16.msra.mxu0 %v3282_v15  ;;  %3317 = vmatpush3.bf16.msra.mxu1 %v3282_v15  ;;  %v752_v15 = vld [vmem:[#allocation6 + $0x178] sm:$0xff] }
  0x6a   : > { %3287 = vmatprep.subr.bf16.mxu0 %v3286_v18  ;;  %3319 = vmatprep.subr.bf16.mxu1 %v3286_v18  ;;  %v4034_v16 = vpack.c.bf16 %v752_v15, %v751_v14 }
  0x6d   : > { %3289 = vmatpush3.bf16.msra.mxu0 %v3286_v18  ;;  %3321 = vmatpush3.bf16.msra.mxu1 %v3286_v18 }
  0x6e   : > { %3291 = vmatprep.subr.bf16.mxu0 %v3290_v21  ;;  %3323 = vmatprep.subr.bf16.mxu1 %v3290_v21 }
  0x71   : > { %3293 = vmatpush3.bf16.msra.mxu0 %v3290_v21  ;;  %3325 = vmatpush3.bf16.msra.mxu1 %v3290_v21  ;;  %v1111_v21 = vlaneseq }
  0x72   : > { %3295 = vmatprep.subr.bf16.mxu0 %v3294_v24  ;;  %3327 = vmatprep.subr.bf16.mxu1 %v3294_v24 }
  0x73   : > { %v1112_v33 = vshrl.u32 %v1111_v21, 7 }
  0x75   : > { %3297 = vmatpush3.bf16.msra.mxu0 %v3294_v24  ;;  %3329 = vmatpush3.bf16.msra.mxu1 %v3294_v24  ;;  %v4050_v39 = vsub.s32 %v1110_v29, %v1112_v33 }
  0x76   : > { %3331 = vmatprep.subr.bf16.mxu0 %v3937_v27  ;;  %3363 = vmatprep.subr.bf16.mxu1 %v3937_v27 }
  0x78   : > { %3035 = vmatmul.mubr.f32.vlgmr.msra.gmra.mrb[0].mxu0 %v3940_v30 }
  0x79   : > { %3333 = vmatpush3.bf16.msra.mxu0 %v3937_v27  ;;  %3037 = vmatprep.mubr.f32.mxu0 %v3944_v31 }
  0x7a   : > { %3335 = vmatprep.subr.bf16.mxu0 %v3946_v32 }
  0x7c   : > { %3038 = vmatmul.mubr.f32.gmra.mrb[2].mxu0 %v3953_v35 }
  0x7d   : > { %3337 = vmatpush3.bf16.msra.mxu0 %v3946_v32  ;;  %3040 = vmatprep.mubr.f32.mxu0 %v3957_v36 }
  0x7e   : > { %3339 = vmatprep.subr.bf16.mxu0 %v3959_v37 }
  0x80   : > { %3041 = vmatmul.mubr.f32.gmra.mrb[4].mxu0 %v3965_v40 }
  0x81   : > { %3341 = vmatpush3.bf16.msra.mxu0 %v3959_v37  ;;  %3043 = vmatprep.mubr.f32.mxu0 %v3969_v41 }
  0x82   : > { %3343 = vmatprep.subr.bf16.mxu0 %v3971_v42 }
  0x84   : > { %3044 = vmatmul.mubr.f32.gmra.mrb[6].mxu0 %v3977_v45 }
  0x85   : > { %3345 = vmatpush3.bf16.msra.mxu0 %v3971_v42  ;;  %3122 = vmatprep.mubr.f32.mxu0 %v3934_v9 }
  0x86   : > { %3347 = vmatprep.subr.bf16.mxu0 %v3980_v46 }
  0x89   : > { %3349 = vmatpush3.bf16.msra.mxu0 %v3980_v46 }
  0x8a   : > { %3351 = vmatprep.subr.bf16.mxu0 %v3986_v49 }
  0x8d   : > { %3353 = vmatpush3.bf16.msra.mxu0 %v3986_v49 }
  0x8e   : > { %3355 = vmatprep.subr.bf16.mxu0 %v3990_v52 }
  0x91   : > { %3357 = vmatpush3.bf16.msra.mxu0 %v3990_v52 }
  0x92   : > { %3359 = vmatprep.subr.bf16.mxu0 %v3994_v55 }
  0x95   : > { %3361 = vmatpush3.bf16.msra.mxu0 %v3994_v55 }
  0x96   : > { %3395 = vmatprep.subr.bf16.mxu0 %v3998_v58 }
  0x98   : > { %3123 = vmatmul.mubr.f32.vlgmr.msra.gmra.mrb[8].mxu0 %v3940_v30 }
  0x99   : > { %3397 = vmatpush3.bf16.msra.mxu0 %v3998_v58  ;;  %3125 = vmatprep.mubr.f32.mxu0 %v3944_v31 }
  0x9a   : > { %3399 = vmatprep.subr.bf16.mxu0 %v4002_v61 }
  0x9c   : > { %3126 = vmatmul.mubr.f32.gmra.mrb[10].mxu0 %v3953_v35 }
  0x9d   : > { %3401 = vmatpush3.bf16.msra.mxu0 %v4002_v61  ;;  %3128 = vmatprep.mubr.f32.mxu0 %v3957_v36 }
  0x9e   : > { %3403 = vmatprep.subr.bf16.mxu0 %v4008_v0 }
  0xa0   : > { %3129 = vmatmul.mubr.f32.gmra.mrb[12].mxu0 %v3965_v40 }
  0xa1   : > { %3405 = vmatpush3.bf16.msra.mxu0 %v4008_v0  ;;  %3131 = vmatprep.mubr.f32.mxu0 %v3969_v41 }
  0xa2   : > { %3407 = vmatprep.subr.bf16.mxu0 %v4014_v3 }
  0xa4   : > { %3132 = vmatmul.mubr.f32.gmra.mrb[14].mxu0 %v3977_v45 }
  0xa5   : > { %3409 = vmatpush3.bf16.msra.mxu0 %v4014_v3  ;;  %3210 = vmatprep.mubr.f32.mxu0 %v3934_v9 }
  0xa6   : > { %3411 = vmatprep.subr.bf16.mxu0 %v4020_v6 }
  0xa9   : > { %3413 = vmatpush3.bf16.msra.mxu0 %v4020_v6 }
  0xaa   : > { %3415 = vmatprep.subr.bf16.mxu0 %v4026_v10 }
  0xad   : > { %3417 = vmatpush3.bf16.msra.mxu0 %v4026_v10 }
  0xae   : > { %3419 = vmatprep.subr.bf16.mxu0 %v4030_v13 }
  0xb1   : > { %3421 = vmatpush3.bf16.msra.mxu0 %v4030_v13 }
  0xb2   : > { %3423 = vmatprep.subr.bf16.mxu0 %v4034_v16 }
  0xb5   : > { %3425 = vmatpush3.bf16.msra.mxu0 %v4034_v16 }
  0xb8   : > { %3211 = vmatmul.mubr.f32.vlgmr.msra.gmra.mrb[16].mxu0 %v3940_v30 }
  0xb9   : > { %3213 = vmatprep.mubr.f32.mxu0 %v3944_v31 }
  0xbc   : > { %3214 = vmatmul.mubr.f32.gmra.mrb[18].mxu0 %v3953_v35 }
  0xbd   : > { %3216 = vmatprep.mubr.f32.mxu0 %v3957_v36 }
  0xc0   : > { %3217 = vmatmul.mubr.f32.gmra.mrb[20].mxu0 %v3965_v40 }
  0xc1   : > { %3219 = vmatprep.mubr.f32.mxu0 %v3969_v41 }
  0xc4   : > { %3220 = vmatmul.mubr.f32.gmra.mrb[22].mxu0 %v3977_v45 }
 0x14b   : > { %v3036_v17 = vpop.f32.mrb[0].mxu0 }
 0x14c   : > { %v329_v18 = vpop.f32.mrb[1].mxu0 }
 0x14d   : > { %3078 = vmatprep.mubr.f32.mxu1 %v329_v18 }
 0x14e   : > { %3079 = vmatmul.mubr.f32.vlgmr.msra.gmra.mrb[0].mxu1 %v3036_v17 }
 0x14f   : > { %v3039_v22 = vpop.f32.mrb[2].mxu0  ;;  %3365 = vmatpush3.bf16.msra.mxu1 %v3937_v27 }
 0x150   : > { %v1240_v23 = vcombine.low %v3036_v17, %v3039_v22  ;;  %v1241_v24 = vcombine.high %v3036_v17, %v3039_v22  ;;  %v339_v25 = vpop.f32.mrb[3].mxu0  ;;  %3367 = vmatprep.subr.bf16.mxu1 %v3946_v32 }
 0x151   : > { %v1104_v26 = vcombine.low %v329_v18, %v339_v25  ;;  %v1105_v28 = vcombine.high %v329_v18, %v339_v25  ;;  %3081 = vmatprep.mubr.f32.mxu1 %v339_v25 }
 0x152   : > { %3082 = vmatmul.mubr.f32.gmra.mrb[2].mxu1 %v3039_v22  ;;  %v4058_v51 = vrot.slane %v1241_v24, %v4050_v39 }
 0x153   : > { %v3042_v34 = vpop.f32.mrb[4].mxu0  ;;  %3369 = vmatpush3.bf16.msra.mxu1 %v3946_v32  ;;  %v4055_v32 = vrot.slane %v1240_v23, %v4050_v39  ;;  %v4070_v56 = vrot.slane %v1105_v28, %v4050_v39 }
 0x154   : > { %v349_v38 = vpop.f32.mrb[5].mxu0  ;;  %3371 = vmatprep.subr.bf16.mxu1 %v3959_v37 }
 0x155   : > { %3084 = vmatprep.mubr.f32.mxu1 %v349_v38 }
 0x156   : > { %3085 = vmatmul.mubr.f32.gmra.mrb[4].mxu1 %v3042_v34 }
 0x157   : > { %v3045_v27 = vpop.f32.mrb[6].mxu0  ;;  %3373 = vmatpush3.bf16.msra.mxu1 %v3959_v37  ;;  %v4067_v37 = vrot.slane %v1104_v26, %v4050_v39 }
 0x158   : > { %v1242_v43 = vcombine.low %v3042_v34, %v3045_v27  ;;  %v1243_v44 = vcombine.high %v3042_v34, %v3045_v27  ;;  %v359_v47 = vpop.f32.mrb[7].mxu0  ;;  %3375 = vmatprep.subr.bf16.mxu1 %v3971_v42 }
 0x159   : > { %v1106_v48 = vcombine.low %v349_v38, %v359_v47  ;;  %v1107_v50 = vcombine.high %v349_v38, %v359_v47  ;;  %3087 = vmatprep.mubr.f32.mxu1 %v359_v47 }
 0x15a   : > { %v4061_v53 = vrot.slane %v1242_v43, %v4050_v39  ;;  %v4064_v54 = vrot.slane %v1243_v44, %v4050_v39  ;;  %3088 = vmatmul.mubr.f32.gmra.mrb[6].mxu1 %v3045_v27 }
 0x15b   : > { %v4073_v57 = vrot.slane %v1106_v48, %v4050_v39  ;;  %v4076_v59 = vrot.slane %v1107_v50, %v4050_v39  ;;  %3377 = vmatpush3.bf16.msra.mxu1 %v3971_v42 }
 0x15c   : > { %v1304_v60 = vcombine.low %v4055_v32, %v4061_v53  ;;  %v1305_v62 = vcombine.high %v4055_v32, %v4061_v53  ;;  %v1306_v63 = vcombine.low %v4058_v51, %v4064_v54  ;;  %v1307_v1 = vcombine.high %v4058_v51, %v4064_v54  ;;  %3379 = vmatprep.subr.bf16.mxu1 %v3980_v46 }
 0x15d   : > { %v1168_v2 = vcombine.low %v4067_v37, %v4073_v57  ;;  %v1169_v42 = vcombine.high %v4067_v37, %v4073_v57  ;;  %v1170_v4 = vcombine.low %v4070_v56, %v4076_v59  ;;  %v1171_v5 = vcombine.high %v4070_v56, %v4076_v59 }
 0x15e   : > { %v4289_v57 = vrot.slane %v1307_v1, %v4050_v39 }
 0x15f   : > { %3381 = vmatpush3.bf16.msra.mxu1 %v3980_v46  ;;  %v4271_v32 = vrot.slane %v1171_v5, %v4050_v39  ;;  %v4277_v53 = vrot.slane %v1170_v4, %v4050_v39 }
 0x160   : > { %3383 = vmatprep.subr.bf16.mxu1 %v3986_v49 }
 0x163   : > { %3385 = vmatpush3.bf16.msra.mxu1 %v3986_v49 }
 0x164   : > { %3387 = vmatprep.subr.bf16.mxu1 %v3990_v52 }
 0x167   : > { %3389 = vmatpush3.bf16.msra.mxu1 %v3990_v52 }
 0x168   : > { %3391 = vmatprep.subr.bf16.mxu1 %v3994_v55 }
 0x16b   : > { %v3124_v7 = vpop.f32.mrb[8].mxu0  ;;  %3393 = vmatpush3.bf16.msra.mxu1 %v3994_v55 }
 0x16c   : > { %v574_v8 = vpop.f32.mrb[9].mxu0  ;;  %3427 = vmatprep.subr.bf16.mxu1 %v3998_v58 }
 0x16d   : > { %3166 = vmatprep.mubr.f32.mxu1 %v574_v8 }
 0x16e   : > { %3167 = vmatmul.mubr.f32.vlgmr.msra.gmra.mrb[8].mxu1 %v3124_v7 }
 0x16f   : > { %v3127_v11 = vpop.f32.mrb[10].mxu0  ;;  %3429 = vmatpush3.bf16.msra.mxu1 %v3998_v58 }
 0x170   : > { %v1512_v46 = vcombine.low %v3124_v7, %v3127_v11  ;;  %v1513_v12 = vcombine.high %v3124_v7, %v3127_v11  ;;  %v584_v49 = vpop.f32.mrb[11].mxu0  ;;  %3431 = vmatprep.subr.bf16.mxu1 %v4002_v61 }
 0x171   : > { %v1376_v14 = vcombine.low %v574_v8, %v584_v49  ;;  %v1377_v52 = vcombine.high %v574_v8, %v584_v49  ;;  %3169 = vmatprep.mubr.f32.mxu1 %v584_v49 }
 0x172   : > { %3170 = vmatmul.mubr.f32.gmra.mrb[10].mxu1 %v3127_v11  ;;  %v4111_v22 = vrot.slane %v1512_v46, %v4050_v39 }
 0x173   : > { %v3130_v15 = vpop.f32.mrb[12].mxu0  ;;  %3433 = vmatpush3.bf16.msra.mxu1 %v4002_v61  ;;  %v4114_v61 = vrot.slane %v1513_v12, %v4050_v39  ;;  %v4126_v25 = vrot.slane %v1377_v52, %v4050_v39 }
 0x174   : > { %v594_v55 = vpop.f32.mrb[13].mxu0  ;;  %3435 = vmatprep.subr.bf16.mxu1 %v4008_v0 }
 0x175   : > { %3172 = vmatprep.mubr.f32.mxu1 %v594_v55 }
 0x176   : > { %3173 = vmatmul.mubr.f32.gmra.mrb[12].mxu1 %v3130_v15 }
 0x177   : > { %v3133_v17 = vpop.f32.mrb[14].mxu0  ;;  %3437 = vmatpush3.bf16.msra.mxu1 %v4008_v0  ;;  %v4123_v0 = vrot.slane %v1376_v14, %v4050_v39 }
 0x178   : > { %v1514_v58 = vcombine.low %v3130_v15, %v3133_v17  ;;  %v1515_v18 = vcombine.high %v3130_v15, %v3133_v17  ;;  %v604_v19 = vpop.f32.mrb[15].mxu0  ;;  %3439 = vmatprep.subr.bf16.mxu1 %v4014_v3 }
 0x179   : > { %v1378_v20 = vcombine.low %v594_v55, %v604_v19  ;;  %v1379_v21 = vcombine.high %v594_v55, %v604_v19  ;;  %3175 = vmatprep.mubr.f32.mxu1 %v604_v19 }
 0x17a   : > { %v4117_v23 = vrot.slane %v1514_v58, %v4050_v39  ;;  %v4120_v24 = vrot.slane %v1515_v18, %v4050_v39  ;;  %3176 = vmatmul.mubr.f32.gmra.mrb[14].mxu1 %v3133_v17 }
 0x17b   : > { %v4129_v26 = vrot.slane %v1378_v20, %v4050_v39  ;;  %v4132_v28 = vrot.slane %v1379_v21, %v4050_v39  ;;  %3441 = vmatpush3.bf16.msra.mxu1 %v4014_v3 }
 0x17c   : > { %v1576_v29 = vcombine.low %v4111_v22, %v4117_v23  ;;  %v1577_v33 = vcombine.high %v4111_v22, %v4117_v23  ;;  %v1578_v34 = vcombine.low %v4114_v61, %v4120_v24  ;;  %v1579_v38 = vcombine.high %v4114_v61, %v4120_v24  ;;  %3443 = vmatprep.subr.bf16.mxu1 %v4020_v6 }
 0x17d   : > { %v1440_v27 = vcombine.low %v4123_v0, %v4129_v26  ;;  %v1441_v3 = vcombine.high %v4123_v0, %v4129_v26  ;;  %v1442_v43 = vcombine.low %v4126_v25, %v4132_v28  ;;  %v1443_v44 = vcombine.high %v4126_v25, %v4132_v28 }
 0x17f   : > { %3445 = vmatpush3.bf16.msra.mxu1 %v4020_v6  ;;  %v1492_v61 = vrot.slane %v1441_v3, %v4050_v39  ;;  %v1499_v24 = vrot.slane %v1443_v44, %v4050_v39 }
 0x180   : > { %3447 = vmatprep.subr.bf16.mxu1 %v4026_v10 }
 0x183   : > { %3449 = vmatpush3.bf16.msra.mxu1 %v4026_v10 }
 0x184   : > { %3451 = vmatprep.subr.bf16.mxu1 %v4030_v13 }
 0x187   : > { %3453 = vmatpush3.bf16.msra.mxu1 %v4030_v13 }
 0x188   : > { %3455 = vmatprep.subr.bf16.mxu1 %v4034_v16 }
 0x18b   : > { %v3212_v47 = vpop.f32.mrb[16].mxu0  ;;  %3457 = vmatpush3.bf16.msra.mxu1 %v4034_v16 }
 0x18c   : > { %v819_v48 = vpop.f32.mrb[17].mxu0 }
 0x18d   : > { %3254 = vmatprep.mubr.f32.mxu1 %v819_v48 }
 0x18e   : > { %3255 = vmatmul.mubr.f32.vlgmr.msra.gmra.mrb[16].mxu1 %v3212_v47 }
 0x18f   : > { %v3215_v50 = vpop.f32.mrb[18].mxu0 }
 0x190   : > { %v1784_v7 = vcombine.low %v3212_v47, %v3215_v50  ;;  %v1785_v8 = vcombine.high %v3212_v47, %v3215_v50  ;;  %v829_v6 = vpop.f32.mrb[19].mxu0 }
 0x191   : > { %v1648_v11 = vcombine.low %v819_v48, %v829_v6  ;;  %v1649_v46 = vcombine.high %v819_v48, %v829_v6  ;;  %3257 = vmatprep.mubr.f32.mxu1 %v829_v6 }
 0x192   : > { %3258 = vmatmul.mubr.f32.gmra.mrb[18].mxu1 %v3215_v50  ;;  %v4160_v55 = vrot.slane %v1784_v7, %v4050_v39  ;;  %v4163_v17 = vrot.slane %v1785_v8, %v4050_v39 }
 0x193   : > { %v3218_v10 = vpop.f32.mrb[20].mxu0  ;;  %v4172_v19 = vrot.slane %v1648_v11, %v4050_v39  ;;  %v4175_v20 = vrot.slane %v1649_v46, %v4050_v39 }
 0x194   : > { %v839_v12 = vpop.f32.mrb[21].mxu0 }
 0x195   : > { %3260 = vmatprep.mubr.f32.mxu1 %v839_v12 }
 0x196   : > { %3261 = vmatmul.mubr.f32.gmra.mrb[20].mxu1 %v3218_v10 }
 0x197   : > { %v3221_v13 = vpop.f32.mrb[22].mxu0 }
 0x198   : > { %v1786_v49 = vcombine.low %v3218_v10, %v3221_v13  ;;  %v1787_v14 = vcombine.high %v3218_v10, %v3221_v13  ;;  %v849_v52 = vpop.f32.mrb[23].mxu0  ;;  %v3746_v10 = vmov 0  }
 0x199   : > { %v1650_v16 = vcombine.low %v839_v12, %v849_v52  ;;  %v1651_v15 = vcombine.high %v839_v12, %v849_v52  ;;  %3263 = vmatprep.mubr.f32.mxu1 %v849_v52  ;;  %v4740_v12 = vmov 0.0   ;;  %v1103_v52 = vcombine.high %v3957_v36, %v3969_v41  ;;  %3601 = vset.pattern.permute.xlu0 %v3746_v10 }
 0x19a   : > { %v4166_v58 = vrot.slane %v1786_v49, %v4050_v39  ;;  %v4169_v18 = vrot.slane %v1787_v14, %v4050_v39  ;;  %3264 = vmatmul.mubr.f32.gmra.mrb[22].mxu1 %v3221_v13  ;;  %2201 = vmatprep.mubr.f32.mxu0 %v4740_v12  ;;  %v1100_v13 = vcombine.low %v3934_v9, %v3944_v31 }
 0x19b   : > { %v4178_v21 = vrot.slane %v1650_v16, %v4050_v39  ;;  %v4181_v47 = vrot.slane %v1651_v15, %v4050_v39  ;;  %2272 = vmatprep.mubr.f32.mxu1 %v4740_v12  ;;  %v1102_v49 = vcombine.low %v3957_v36, %v3969_v41  ;;  %v1101_v14 = vcombine.high %v3934_v9, %v3944_v31  ;;  %v982_v16 = vld [vmem:[%s4735_s3] sm:$0xff] }
 0x19c   : > { %v1236_v15 = vcombine.low %v3940_v30, %v3953_v35  ;;  %v1238_v12 = vcombine.low %v3965_v40, %v3977_v45  ;;  %1041 = vperm.xlu0 %3601, %v982_v16   ;;  %v1114_v11 = vrot.slane %v1100_v13, %v4050_v39  ;;  %v1237_v31 = vcombine.high %v3940_v30, %v3953_v35 }
 0x19d   : > { %v1128_v9 = vrot.slane %v1102_v49, %v4050_v39  ;;  %v1239_v36 = vcombine.high %v3965_v40, %v3977_v45  ;;  %v1121_v41 = vrot.slane %v1101_v14, %v4050_v39  ;;  %v1135_v46 = vrot.slane %v1103_v52, %v4050_v39 }
 0x19e   : > { %v1250_v6 = vrot.slane %v1236_v15, %v4050_v39  ;;  %v1264_v8 = vrot.slane %v1238_v12, %v4050_v39  ;;  %v1257_v13 = vrot.slane %v1237_v31, %v4050_v39 }
 0x19f   : > { %v1165_v10 = vcombine.high %v1114_v11, %v1128_v9  ;;  %v1164_v16 = vcombine.low %v1114_v11, %v1128_v9  ;;  %v1167_v50 = vcombine.high %v1121_v41, %v1135_v46  ;;  %v1271_v49 = vrot.slane %v1239_v36, %v4050_v39 }
 0x1a0   : > { %v1301_v30 = vcombine.high %v1250_v6, %v1264_v8  ;;  %v1300_v35 = vcombine.low %v1250_v6, %v1264_v8  ;;  %v1166_v40 = vcombine.low %v1121_v41, %v1135_v46  ;;  %v4244_v8 = vrot.slane %v1305_v62, %v4050_v39 }
 0x1a1   : > { %v4229_v45 = vrot.slane %v1165_v10, %v4050_v39  ;;  %v4232_v14 = vrot.slane %v1164_v16, %v4050_v39  ;;  %v4235_v12 = vrot.slane %v1167_v50, %v4050_v39  ;;  %v1303_v11 = vcombine.high %v1257_v13, %v1271_v49 }
 0x1a2   : > { %v4238_v15 = vrot.slane %v1301_v30, %v4050_v39  ;;  %v4247_v6 = vrot.slane %v1300_v35, %v4050_v39  ;;  %v1302_v46 = vcombine.low %v1257_v13, %v1271_v49  ;;  %v4253_v50 = vrot.slane %v1304_v60, %v4050_v39 }
 0x1a3   : > { %v4259_v41 = vrot.slane %v1169_v42, %v4050_v39  ;;  %v4265_v62 = vrot.slane %v1168_v2, %v4050_v39  ;;  %v4280_v60 = vrot.slane %v1166_v40, %v4050_v39  ;;  %v4283_v37 = vrot.slane %v1303_v11, %v4050_v39 }
 0x1a4   : > { %v4295_v2 = vrot.slane %v1306_v63, %v4050_v39  ;;  %v1368_v59 = vcombine.low %v4238_v15, %v4244_v8  ;;  %v1369_v42 = vcombine.high %v4238_v15, %v4244_v8  ;;  %v4302_v4 = vrot.slane %v1302_v46, %v4050_v39 }
 0x1a5   : > { %v1232_v1 = vcombine.low %v4229_v45, %v4259_v41  ;;  %v1364_v51 = vcombine.low %v4247_v6, %v4253_v50  ;;  %v1365_v54 = vcombine.high %v4247_v6, %v4253_v50  ;;  %v1228_v63 = vcombine.low %v4232_v14, %v4265_v62 }
 0x1a6   : > { %v1234_v13 = vcombine.low %v4235_v12, %v4271_v32  ;;  %v1235_v49 = vcombine.high %v4235_v12, %v4271_v32  ;;  %v1230_v30 = vcombine.low %v4280_v60, %v4277_v53  ;;  %v1231_v35 = vcombine.high %v4280_v60, %v4277_v53 }
 0x1a7   : > { %v1370_v40 = vcombine.low %v4283_v37, %v4289_v57  ;;  %v4338_v12 = vrot.slane %v1578_v34, %v4050_v39  ;;  %v4348_v46 = vrot.slane %v1579_v38, %v4050_v39  ;;  %v1485_v34 = vrot.slane %v1442_v43, %v4050_v39 }
 0x1a8   : > { %v1366_v15 = vcombine.low %v4302_v4, %v4295_v2  ;;  %v4753_v50 = vcombine.high %v4283_v37, %v4289_v57  ;;  %v4754_v37 = vcombine.low %v4160_v55, %v4166_v58 }
 0x1aa   : > { %v4438_v57 = vrot.slane %v4754_v37, %v4050_v39 }
 0x221   : > { %v3080_v7 = vpop.f32.mrb[0].mxu1 }
 0x222   : > { %v443_v48 = vpop.f32.mrb[1].mxu1 }
 0x225   : > { %v3083_v52 = vpop.f32.mrb[2].mxu1 }
 0x226   : > { %v1508_v9 = vcombine.low %v3080_v7, %v3083_v52  ;;  %v1509_v31 = vcombine.high %v3080_v7, %v3083_v52  ;;  %v453_v36 = vpop.f32.mrb[3].mxu1  ;;  %v1229_v7 = vcombine.high %v4232_v14, %v4265_v62  ;;  %v4332_v14 = vrot.slane %v1576_v29, %v4050_v39 }
 0x227   : > { %v1372_v10 = vcombine.low %v443_v48, %v453_v36  ;;  %v1373_v16 = vcombine.high %v443_v48, %v453_v36  ;;  %v1233_v48 = vcombine.high %v4229_v45, %v4259_v41  ;;  %v1628_v52 = vrot.slane %v1577_v33, %v4050_v39 }
 0x228   : > { %v1478_v29 = vrot.slane %v1440_v27, %v4050_v39  ;;  %v1522_v38 = vrot.slane %v1508_v9, %v4050_v39  ;;  %v1529_v27 = vrot.slane %v1509_v31, %v4050_v39 }
 0x229   : > { %v3086_v56 = vpop.f32.mrb[4].mxu1  ;;  %v1386_v32 = vrot.slane %v1372_v10, %v4050_v39  ;;  %v1393_v53 = vrot.slane %v1373_v16, %v4050_v39 }
 0x22a   : > { %v463_v5 = vpop.f32.mrb[5].mxu1 }
 0x22d   : > { %v3089_v11 = vpop.f32.mrb[6].mxu1 }
 0x22e   : > { %v1510_v36 = vcombine.low %v3086_v56, %v3089_v11  ;;  %v1511_v41 = vcombine.high %v3086_v56, %v3089_v11  ;;  %v473_v22 = vpop.f32.mrb[7].mxu1 }
 0x22f   : > { %v1374_v23 = vcombine.low %v463_v5, %v473_v22  ;;  %v1375_v33 = vcombine.high %v463_v5, %v473_v22 }
 0x230   : > { %v1536_v43 = vrot.slane %v1510_v36, %v4050_v39  ;;  %v1543_v62 = vrot.slane %v1511_v41, %v4050_v39 }
 0x231   : > { %v1400_v0 = vrot.slane %v1374_v23, %v4050_v39  ;;  %v1407_v26 = vrot.slane %v1375_v33, %v4050_v39 }
 0x232   : > { %v1572_v3 = vcombine.low %v1522_v38, %v1536_v43  ;;  %v1573_v60 = vcombine.high %v1522_v38, %v1536_v43  ;;  %v1574_v25 = vcombine.low %v1529_v27, %v1543_v62  ;;  %v1575_v28 = vcombine.high %v1529_v27, %v1543_v62 }
 0x233   : > { %v1436_v44 = vcombine.low %v1386_v32, %v1400_v0  ;;  %v1437_v9 = vcombine.high %v1386_v32, %v1400_v0  ;;  %v1438_v56 = vcombine.low %v1393_v53, %v1407_v26  ;;  %v1439_v31 = vcombine.high %v1393_v53, %v1407_v26 }
 0x234   : > { %v1586_v5 = vrot.slane %v1572_v3, %v4050_v39  ;;  %v1593_v11 = vrot.slane %v1574_v25, %v4050_v39  ;;  %v1600_v10 = vrot.slane %v1573_v60, %v4050_v39  ;;  %v1607_v16 = vrot.slane %v1575_v28, %v4050_v39 }
 0x235   : > { %v1450_v36 = vrot.slane %v1436_v44, %v4050_v39  ;;  %v1457_v41 = vrot.slane %v1438_v56, %v4050_v39  ;;  %v1464_v22 = vrot.slane %v1437_v9, %v4050_v39  ;;  %v1471_v23 = vrot.slane %v1439_v31, %v4050_v39 }
 0x236   : > { %v1640_v33 = vcombine.low %v1600_v10, %v1628_v52  ;;  %v1641_v38 = vcombine.high %v1600_v10, %v1628_v52  ;;  %v1636_v27 = vcombine.low %v1586_v5, %v4332_v14  ;;  %v1637_v43 = vcombine.high %v1586_v5, %v4332_v14 }
 0x237   : > { %v1504_v62 = vcombine.low %v1464_v22, %v1492_v61  ;;  %v1505_v32 = vcombine.high %v1464_v22, %v1492_v61  ;;  %v1500_v53 = vcombine.low %v1450_v36, %v1478_v29  ;;  %v1501_v0 = vcombine.high %v1450_v36, %v1478_v29 }
 0x238   : > { %v1506_v26 = vcombine.low %v1471_v23, %v1499_v24  ;;  %v1507_v3 = vcombine.high %v1471_v23, %v1499_v24  ;;  %v1502_v60 = vcombine.low %v1457_v41, %v1485_v34  ;;  %v1503_v25 = vcombine.high %v1457_v41, %v1485_v34 }
 0x239   : > { %v3458_v28 = vpack.c.bf16 %v1504_v62, %v1232_v1  ;;  %v3468_v44 = vpack.c.bf16 %v1505_v32, %v1233_v48  ;;  %v3460_v56 = vpack.c.bf16 %v1500_v53, %v1228_v63  ;;  %v3470_v9 = vpack.c.bf16 %v1501_v0, %v1229_v7 }
 0x23a   : > { %v4384_v45 = vpack.c.bf16 %v1506_v26, %v1234_v13  ;;  %v4386_v31 = vpack.c.bf16 %v1507_v3, %v1235_v49  ;;  %v4388_v52 = vpack.c.bf16 %v1502_v60, %v1230_v30  ;;  %v4390_v10 = vpack.c.bf16 %v1503_v25, %v1231_v35 }
 0x23b   : > { %3459 = vmatprep.subr.bf16.mxu0 %v3458_v28  ;;  %3469 = vmatprep.subr.bf16.mxu1 %v3468_v44  ;;  %v4395_v14 = vpack.c.bf16 %v1640_v33, %v1368_v59  ;;  %v4400_v1 = vpack.c.bf16 %v1641_v38, %v1369_v42  ;;  %v4405_v48 = vpack.c.bf16 %v1636_v27, %v1364_v51 }
 0x23c   : > { %3461 = vmatpush1.bf16.msra.mxu0 %v3460_v56  ;;  %3471 = vmatpush1.bf16.msra.mxu1 %v3470_v9  ;;  %v4410_v63 = vpack.c.bf16 %v1637_v43, %v1365_v54  ;;  %v1642_v59 = vcombine.low %v1607_v16, %v4348_v46  ;;  %v1643_v7 = vcombine.high %v1607_v16, %v4348_v46 }
 0x23d   : > { %v1638_v8 = vcombine.low %v1593_v11, %v4338_v12  ;;  %v1367_v42 = vcombine.high %v4302_v4, %v4295_v2  ;;  %v1639_v51 = vcombine.high %v1593_v11, %v4338_v12  ;;  %v4755_v24 = vcombine.low %v4163_v17, %v4169_v18 }
 0x23e   : > { %v4423_v6 = vpack.c.bf16 %v1642_v59, %v1370_v40  ;;  %v4428_v54 = vpack.c.bf16 %v1643_v7, %v4753_v50  ;;  %v4756_v11 = vcombine.high %v4160_v55, %v4166_v58  ;;  %v4757_v36 = vcombine.high %v4163_v17, %v4169_v18 }
 0x23f   : > { %v4430_v13 = vpack.c.bf16 %v1638_v8, %v1366_v15  ;;  %v4432_v49 = vpack.c.bf16 %v1639_v51, %v1367_v42  ;;  %v4444_v5 = vrot.slane %v4755_v24, %v4050_v39  ;;  %v4758_v23 = vcombine.low %v4172_v19, %v4178_v21 }
 0x240   : > { %v4450_v16 = vrot.slane %v4756_v11, %v4050_v39  ;;  %v4456_v41 = vrot.slane %v4757_v36, %v4050_v39  ;;  %v4759_v38 = vcombine.low %v4175_v20, %v4181_v47  ;;  %v4760_v17 = vcombine.high %v4172_v19, %v4178_v21 }
 0x241   : > { %v3168_v30 = vpop.f32.mrb[8].mxu1  ;;  %v4462_v33 = vrot.slane %v4758_v23, %v4050_v39  ;;  %v4761_v62 = vcombine.high %v4175_v20, %v4181_v47 }
 0x242   : > { %v688_v35 = vpop.f32.mrb[9].mxu1  ;;  %v4468_v55 = vrot.slane %v4759_v38, %v4050_v39  ;;  %v4474_v18 = vrot.slane %v4760_v17, %v4050_v39 }
 0x243   : > { %v4480_v32 = vrot.slane %v4761_v62, %v4050_v39 }
 0x245   : > { %v3171_v46 = vpop.f32.mrb[10].mxu1 }
 0x246   : > { %v1780_v2 = vcombine.low %v3168_v30, %v3171_v46  ;;  %v1781_v4 = vcombine.high %v3168_v30, %v3171_v46  ;;  %v698_v12 = vpop.f32.mrb[11].mxu1 }
 0x247   : > { %v1644_v29 = vcombine.low %v688_v35, %v698_v12  ;;  %v1645_v34 = vcombine.high %v688_v35, %v698_v12 }
 0x248   : > { %v1794_v26 = vrot.slane %v1780_v2, %v4050_v39  ;;  %v1801_v3 = vrot.slane %v1781_v4, %v4050_v39 }
 0x249   : > { %v3174_v61 = vpop.f32.mrb[12].mxu1  ;;  %v1658_v19 = vrot.slane %v1644_v29, %v4050_v39  ;;  %v1665_v21 = vrot.slane %v1645_v34, %v4050_v39 }
 0x24a   : > { %v708_v40 = vpop.f32.mrb[13].mxu1 }
 0x24d   : > { %v3177_v22 = vpop.f32.mrb[14].mxu1 }
 0x24e   : > { %v1782_v58 = vcombine.low %v3174_v61, %v3177_v22  ;;  %v1783_v27 = vcombine.high %v3174_v61, %v3177_v22  ;;  %v718_v43 = vpop.f32.mrb[15].mxu1 }
 0x24f   : > { %v1646_v53 = vcombine.low %v708_v40, %v718_v43  ;;  %v1647_v0 = vcombine.high %v708_v40, %v718_v43 }
 0x250   : > { %v1808_v60 = vrot.slane %v1782_v58, %v4050_v39  ;;  %v1815_v25 = vrot.slane %v1783_v27, %v4050_v39 }
 0x251   : > { %v1672_v28 = vrot.slane %v1646_v53, %v4050_v39  ;;  %v1679_v20 = vrot.slane %v1647_v0, %v4050_v39 }
 0x252   : > { %v1844_v47 = vcombine.low %v1794_v26, %v1808_v60  ;;  %v1845_v44 = vcombine.high %v1794_v26, %v1808_v60  ;;  %v1846_v56 = vcombine.low %v1801_v3, %v1815_v25  ;;  %v1847_v9 = vcombine.high %v1801_v3, %v1815_v25 }
 0x253   : > { %v1708_v59 = vcombine.low %v1658_v19, %v1672_v28  ;;  %v1709_v7 = vcombine.high %v1658_v19, %v1672_v28  ;;  %v1710_v15 = vcombine.low %v1665_v21, %v1679_v20  ;;  %v1711_v8 = vcombine.high %v1665_v21, %v1679_v20 }
 0x254   : > { %v4491_v42 = vrot.slane %v1844_v47, %v4050_v39  ;;  %v4494_v51 = vrot.slane %v1846_v56, %v4050_v39  ;;  %v4497_v50 = vrot.slane %v1845_v44, %v4050_v39  ;;  %v4500_v30 = vrot.slane %v1847_v9, %v4050_v39 }
 0x255   : > { %v4503_v35 = vrot.slane %v1708_v59, %v4050_v39  ;;  %v4506_v46 = vrot.slane %v1710_v15, %v4050_v39  ;;  %v4509_v2 = vrot.slane %v1709_v7, %v4050_v39  ;;  %v4512_v4 = vrot.slane %v1711_v8, %v4050_v39 }
 0x256   : > { %v1908_v12 = vcombine.low %v4491_v42, %v4438_v57  ;;  %v1909_v29 = vcombine.high %v4491_v42, %v4438_v57  ;;  %v1910_v34 = vcombine.low %v4494_v51, %v4444_v5  ;;  %v1911_v61 = vcombine.high %v4494_v51, %v4444_v5  ;;  %v981_v51 = vld [vmem:[%s4734_s2] sm:$0xff] }
 0x257   : > { %v1772_v40 = vcombine.low %v4503_v35, %v4462_v33  ;;  %v1773_v37 = vcombine.high %v4503_v35, %v4462_v33  ;;  %v1774_v24 = vcombine.low %v4506_v46, %v4468_v55  ;;  %v1775_v11 = vcombine.high %v4506_v46, %v4468_v55 }
 0x258   : > { %v1776_v36 = vcombine.low %v4509_v2, %v4474_v18  ;;  %v1777_v22 = vcombine.high %v4509_v2, %v4474_v18  ;;  %v1778_v23 = vcombine.low %v4512_v4, %v4480_v32  ;;  %v1912_v58 = vcombine.low %v4497_v50, %v4450_v16 }
 0x259   : > { %v1914_v43 = vcombine.low %v4500_v30, %v4456_v41  ;;  %v4764_v18 = vcombine.high %v4512_v4, %v4480_v32  ;;  %v4765_v2 = vcombine.high %v4497_v50, %v4450_v16  ;;  %v4767_v32 = vmov 0.0  }
 0x261   : > { %v3256_v62 = vpop.f32.mrb[16].mxu1 }
 0x262   : > { %v933_v53 = vpop.f32.mrb[17].mxu1 }
 0x265   : > { %v3259_v0 = vpop.f32.mrb[18].mxu1 }
 0x266   : > { %v1984_v26 = vcombine.low %v3256_v62, %v3259_v0  ;;  %v1985_v3 = vcombine.high %v3256_v62, %v3259_v0  ;;  %v943_v60 = vpop.f32.mrb[19].mxu1 }
 0x267   : > { %v1916_v25 = vcombine.low %v933_v53, %v943_v60  ;;  %v1917_v19 = vcombine.high %v933_v53, %v943_v60 }
 0x268   : > { %v1994_v7 = vrot.slane %v1984_v26, %v4050_v39  ;;  %v2001_v15 = vrot.slane %v1985_v3, %v4050_v39 }
 0x269   : > { %v3262_v21 = vpop.f32.mrb[20].mxu1  ;;  %v1926_v0 = vrot.slane %v1916_v25, %v4050_v39  ;;  %v1933_v53 = vrot.slane %v1917_v19, %v4050_v39 }
 0x26a   : > { %v953_v28 = vpop.f32.mrb[21].mxu1 }
 0x26d   : > { %v3265_v20 = vpop.f32.mrb[22].mxu1 }
 0x26e   : > { %v1986_v47 = vcombine.low %v3262_v21, %v3265_v20  ;;  %v1987_v44 = vcombine.high %v3262_v21, %v3265_v20  ;;  %v963_v56 = vpop.f32.mrb[23].mxu1 }
 0x26f   : > { %v1918_v9 = vcombine.low %v953_v28, %v963_v56  ;;  %v1919_v59 = vcombine.high %v953_v28, %v963_v56 }
 0x270   : > { %v2008_v8 = vrot.slane %v1986_v47, %v4050_v39  ;;  %v2015_v62 = vrot.slane %v1987_v44, %v4050_v39 }
 0x271   : > { %v1940_v60 = vrot.slane %v1918_v9, %v4050_v39  ;;  %v1947_v21 = vrot.slane %v1919_v59, %v4050_v39 }
 0x272   : > { %v2016_v20 = vcombine.low %v1994_v7, %v2008_v8  ;;  %v2017_v17 = vcombine.high %v1994_v7, %v2008_v8  ;;  %v2018_v28 = vcombine.low %v2001_v15, %v2015_v62  ;;  %v2019_v56 = vcombine.high %v2001_v15, %v2015_v62 }
 0x273   : > { %v1948_v27 = vcombine.low %v1926_v0, %v1940_v60  ;;  %v1949_v26 = vcombine.high %v1926_v0, %v1940_v60  ;;  %v1950_v38 = vcombine.low %v1933_v53, %v1947_v21  ;;  %v1951_v3 = vcombine.high %v1933_v53, %v1947_v21 }
 0x274   : > { %v2026_v47 = vrot.slane %v2016_v20, %v4050_v39  ;;  %v2033_v44 = vrot.slane %v2018_v28, %v4050_v39  ;;  %v2040_v25 = vrot.slane %v2017_v17, %v4050_v39  ;;  %v2047_v19 = vrot.slane %v2019_v56, %v4050_v39 }
 0x275   : > { %v1958_v9 = vrot.slane %v1948_v27, %v4050_v39  ;;  %v1965_v59 = vrot.slane %v1950_v38, %v4050_v39  ;;  %v1972_v7 = vrot.slane %v1949_v26, %v4050_v39  ;;  %v1979_v15 = vrot.slane %v1951_v3, %v4050_v39 }
 0x276   : > { %v2048_v8 = vcombine.high %v2026_v47, %v2026_v47  ;;  %v2049_v62 = vcombine.high %v2033_v44, %v2033_v44  ;;  %v3505_v0 = vpack.c.bf16 %v2026_v47, %v1908_v12  ;;  %v4562_v53 = vpack.c.bf16 %v2033_v44, %v1910_v34 }
 0x277   : > { %v1980_v60 = vcombine.high %v1958_v9, %v1958_v9  ;;  %v1981_v21 = vcombine.high %v1965_v59, %v1965_v59  ;;  %v3465_v20 = vpack.c.bf16 %v1958_v9, %v1772_v40  ;;  %v3485_v28 = vpack.c.bf16 %v1965_v59, %v1774_v24 }
 0x278   : > { %v3515_v38 = vpack.c.bf16 %v2048_v8, %v1909_v29  ;;  %v3535_v39 = vpack.c.bf16 %v2049_v62, %v1911_v61  ;;  %v3462_v12 = vpack.c.bf16 %v1972_v7, %v1776_v36  ;;  %v1982_v34 = vcombine.high %v1972_v7, %v1972_v7 }
 0x279   : > { %v3475_v40 = vpack.c.bf16 %v1980_v60, %v1773_v37  ;;  %v3495_v24 = vpack.c.bf16 %v1981_v21, %v1775_v11  ;;  %v3482_v27 = vpack.c.bf16 %v1979_v15, %v1778_v23  ;;  %v1983_v57 = vcombine.high %v1979_v15, %v1979_v15 }
 0x27a   : > { %3464 = vmatprep.subr.msk.bf16.mxu0 %vm4565_vm2, %v3462_v12  ;;  %v3472_v5 = vpack.c.bf16 %v1982_v34, %v1777_v22  ;;  %v3502_v33 = vpack.c.bf16 %v2040_v25, %v1912_v58  ;;  %v2050_v42 = vcombine.high %v2040_v25, %v2040_v25  ;;  %v3522_v55 = vpack.c.bf16 %v2047_v19, %v1914_v43 }
 0x27b   : > { %3467 = vmatpush1.bf16.msk.msra.mxu0 %vm4565_vm2, %v3465_v20  ;;  %v3492_v35 = vpack.c.bf16 %v1983_v57, %v4764_v18  ;;  %v2051_v46 = vcombine.high %v2047_v19, %v2047_v19  ;;  %v4766_v61 = vcombine.high %v4500_v30, %v4456_v41 }
 0x27c   : > { %3474 = vmatprep.subr.msk.bf16.mxu1 %vm4565_vm2, %v3472_v5  ;;  %3479 = vmatprep.subr.bf16.mxu0 %v4384_v45  ;;  %v3512_v29 = vpack.c.bf16 %v2050_v42, %v4765_v2  ;;  %v1042_v45 = vpop.permute.xlu0 %1041 }
 0x27d   : > { %3477 = vmatpush1.bf16.msk.msra.mxu1 %vm4565_vm2, %v3475_v40  ;;  %v3532_v37 = vpack.c.bf16 %v2051_v46, %v4766_v61 }
 0x27e   : > { %3489 = vmatprep.subr.bf16.mxu1 %v4386_v31  ;;  %2829 = vmatmul.mubr.msk.f32.vlgmr.msra.gmra.mrb[24].mxu0 %vm2100_vm3, %v981_v51 }
 0x27f   : > { %3481 = vmatpush1.bf16.msra.mxu0 %v4388_v52  ;;  %2343 = vmatprep.mubr.f32.mxu0 %v4767_v32 }
 0x280   : > { %3484 = vmatprep.subr.msk.bf16.mxu0 %vm4565_vm2, %v3482_v27  ;;  %2832 = vmatmul.mubr.msk.f32.vlgmr.msra.gmra.mrb[24].mxu1 %vm2100_vm3, %v981_v51 }
 0x281   : > { %3491 = vmatpush1.bf16.msra.mxu1 %v4390_v10  ;;  %2414 = vmatprep.mubr.f32.mxu1 %v4767_v32 }
 0x282   : > { %3494 = vmatprep.subr.msk.bf16.mxu1 %vm4565_vm2, %v3492_v35 }
 0x283   : > { %3487 = vmatpush1.bf16.msk.msra.mxu0 %vm4565_vm2, %v3485_v28 }
 0x284   : > { %3499 = vmatprep.subr.bf16.mxu0 %v4395_v14 }
 0x285   : > { %3497 = vmatpush1.bf16.msk.msra.mxu1 %vm4565_vm2, %v3495_v24 }
 0x286   : > { %3509 = vmatprep.subr.bf16.mxu1 %v4400_v1  ;;  %2835 = vmatmul.mubr.msk.f32.vlgmr.msra.gmra.mrb[26].mxu0 %vm2100_vm3, %v981_v51 }
 0x287   : > { %3501 = vmatpush1.bf16.msra.mxu0 %v4405_v48  ;;  %2485 = vmatprep.mubr.f32.mxu0 %v4767_v32 }
 0x288   : > { %3504 = vmatprep.subr.msk.bf16.mxu0 %vm4565_vm2, %v3502_v33  ;;  %2838 = vmatmul.mubr.msk.f32.vlgmr.msra.gmra.mrb[26].mxu1 %vm2100_vm3, %v981_v51 }
 0x289   : > { %3511 = vmatpush1.bf16.msra.mxu1 %v4410_v63  ;;  %2556 = vmatprep.mubr.f32.mxu1 %v4767_v32 }
 0x28a   : > { %3514 = vmatprep.subr.msk.bf16.mxu1 %vm4565_vm2, %v3512_v29 }
 0x28b   : > { %3507 = vmatpush1.bf16.msk.msra.mxu0 %vm4565_vm2, %v3505_v0 }
 0x28c   : > { %3519 = vmatprep.subr.bf16.mxu0 %v4423_v6 }
 0x28d   : > { %3517 = vmatpush1.bf16.msk.msra.mxu1 %vm4565_vm2, %v3515_v38 }
 0x28e   : > { %3529 = vmatprep.subr.bf16.mxu1 %v4428_v54  ;;  %2841 = vmatmul.mubr.msk.f32.vlgmr.msra.gmra.mrb[28].mxu0 %vm2100_vm3, %v981_v51 }
 0x28f   : > { %3521 = vmatpush1.bf16.msra.mxu0 %v4430_v13  ;;  %2627 = vmatprep.mubr.f32.mxu0 %v4767_v32 }
 0x290   : > { %3524 = vmatprep.subr.msk.bf16.mxu0 %vm4565_vm2, %v3522_v55  ;;  %2844 = vmatmul.mubr.msk.f32.vlgmr.msra.gmra.mrb[28].mxu1 %vm2100_vm3, %v981_v51 }
 0x291   : > { %3531 = vmatpush1.bf16.msra.mxu1 %v4432_v49  ;;  %2698 = vmatprep.mubr.f32.mxu1 %v4767_v32 }
 0x292   : > { %3534 = vmatprep.subr.msk.bf16.mxu1 %vm4565_vm2, %v3532_v37 }
 0x293   : > { %3527 = vmatpush1.bf16.msk.msra.mxu0 %vm4565_vm2, %v4562_v53 }
 0x295   : > { %3537 = vmatpush1.bf16.msk.msra.mxu1 %vm4565_vm2, %v3535_v39 }
 0x296   : > { %2847 = vmatmul.mubr.msk.f32.vlgmr.msra.gmra.mrb[30].mxu0 %vm2100_vm3, %v981_v51 }
 0x298   : > { %2850 = vmatmul.mubr.msk.f32.vlgmr.msra.gmra.mrb[30].mxu1 %vm2100_vm3, %v981_v51 }
 0x351   : > { %v2203_v31 = vpop.f32.mrb[24].mxu0 }
 0x352   : > { %v2204_v52 = vadd.f32 %v2203_v31, %v1042_v45  ;;  %v2205_v10 = vpop.f32.mrb[25].mxu0 }
 0x353   : > { %v2274_v14 = vpop.f32.mrb[24].mxu1  ;;  %v2206_v1 = vadd.f32 %v2205_v10, %v1042_v45 }
 0x354   : > { %v2275_v48 = vadd.f32 %v2274_v14, %v1042_v45  ;;  %2705 = vst [vmem:[%s4665_s28] sm:$0xff] %v2204_v52  ;;  %v2276_v63 = vpop.f32.mrb[25].mxu1 }
 0x355   : > { %2706 = vst [vmem:[%s4665_s28 + $0x8] sm:$0xff] %v2206_v1  ;;  %v2277_v6 = vadd.f32 %v2276_v63, %v1042_v45 }
 0x356   : > { %2707 = vst [vmem:[%s4665_s28 + $0x10] sm:$0xff] %v2275_v48 }
 0x357   : > { %2708 = vst [vmem:[%s4665_s28 + $0x18] sm:$0xff] %v2277_v6 }
 0x359   : > { %v2345_v54 = vpop.f32.mrb[26].mxu0 }
 0x35a   : > { %v2346_v13 = vadd.f32 %v2345_v54, %v1042_v45  ;;  %v2347_v49 = vpop.f32.mrb[27].mxu0 }
 0x35b   : > { %v2416_v16 = vpop.f32.mrb[26].mxu1  ;;  %v2348_v41 = vadd.f32 %v2347_v49, %v1042_v45 }
 0x35c   : > { %2709 = vst [vmem:[%s4665_s28 + $0x20] sm:$0xff] %v2346_v13  ;;  %v2417_v50 = vadd.f32 %v2416_v16, %v1042_v45  ;;  %v2418_v30 = vpop.f32.mrb[27].mxu1 }
 0x35d   : > { %2710 = vst [vmem:[%s4665_s28 + $0x28] sm:$0xff] %v2348_v41  ;;  %v2419_v4 = vadd.f32 %v2418_v30, %v1042_v45 }
 0x35e   : > { %2711 = vst [vmem:[%s4665_s28 + $0x30] sm:$0xff] %v2417_v50 }
 0x35f   : > { %2712 = vst [vmem:[%s4665_s28 + $0x38] sm:$0xff] %v2419_v4 }
 0x361   : > { %v2487_v11 = vpop.f32.mrb[28].mxu0 }
 0x362   : > { %v2488_v36 = vadd.f32 %v2487_v11, %v1042_v45  ;;  %v2489_v22 = vpop.f32.mrb[29].mxu0 }
 0x363   : > { %v2558_v23 = vpop.f32.mrb[28].mxu1  ;;  %v2490_v58 = vadd.f32 %v2489_v22, %v1042_v45 }
 0x364   : > { %2713 = vst [vmem:[%s4665_s28 + $0x40] sm:$0xff] %v2488_v36  ;;  %v2559_v43 = vadd.f32 %v2558_v23, %v1042_v45  ;;  %v2560_v56 = vpop.f32.mrb[29].mxu1 }
 0x365   : > { %2714 = vst [vmem:[%s4665_s28 + $0x48] sm:$0xff] %v2490_v58  ;;  %v2561_v26 = vadd.f32 %v2560_v56, %v1042_v45 }
 0x366   : > { %2715 = vst [vmem:[%s4665_s28 + $0x50] sm:$0xff] %v2559_v43 }
 0x367   : > { %2716 = vst [vmem:[%s4665_s28 + $0x58] sm:$0xff] %v2561_v26 }
 0x369   : > { %v2629_v3 = vpop.f32.mrb[30].mxu0 }
 0x36a   : > { %v2630_v47 = vadd.f32 %v2629_v3, %v1042_v45  ;;  %v2631_v44 = vpop.f32.mrb[31].mxu0 }
 0x36b   : > { %v2700_v25 = vpop.f32.mrb[30].mxu1  ;;  %v2632_v19 = vadd.f32 %v2631_v44, %v1042_v45 }
 0x36c   : > { %2717 = vst [vmem:[%s4665_s28 + $0x60] sm:$0xff] %v2630_v47  ;;  %v2701_v9 = vadd.f32 %v2700_v25, %v1042_v45  ;;  %v2702_v59 = vpop.f32.mrb[31].mxu1 }
 0x36d   : > { %2718 = vst [vmem:[%s4665_s28 + $0x68] sm:$0xff] %v2632_v19  ;;  %v2703_v7 = vadd.f32 %v2702_v59, %v1042_v45 }
 0x36e   : > { %2719 = vst [vmem:[%s4665_s28 + $0x70] sm:$0xff] %v2701_v9 }
 0x36f   : > { %2720 = vst [vmem:[%s4665_s28 + $0x78] sm:$0xff] %v2703_v7 }
 0x370   : > { %3681 = shalt.err (!%p3678_p7)
}
 0x371   : > { %s3682_s11 = scalar_lea.hbm %s4686_s8, 2048  ;;  %s3686_s23 = scalar_lea.hbm %s4736_s4, 4096 }
 0x372   : > { %p3683_p9 = scmp.ne.s32.totalorder %s4686_s8, %s3682_s11  ;;  %p3687_p5 = scmp.lt.u32.totalorder %s4686_s8, %s4736_s4 }
 0x373   : > { %p3688_p11 = scmp.lt.u32.totalorder %s3686_s23, %s3682_s11  ;;  %p3690_p4 = scmp.lt.u32.totalorder %s3682_s11, %s4686_s8 }
 0x374   : > { %p3684_p1 = pnand %p3683_p9, %p3868_p12 }
 0x375   : > { %p3689_p2 = por %p3688_p11, %p3687_p5 }
 0x376   : > { %p3685_p0 = pneg %p3684_p1 }
 0x377   : > { %p3691_p6 = por %p3690_p4, %p3689_p2 }
 0x379   : > { %p3692_p8 = pnand %p3691_p6, %p3685_p0 }
 0x37b   : > { %3695 = shalt.err (!%p3692_p8)
}
 0x37c   : > { %3544 = dma.vmem_to_hbm [thread:$0]  (%p3868_p12), %s4688_s10, 2048, %s4686_s8, %s2722_s19  }
 0x37d PF: > { %s2748_s9 = sand.u32 1, %s3726_s15   ;;  %p4768_p10 = scmp.ne.s32.totalorder %s4743_s22, 0 }
 0x37e   : > { %p4769_p13 = scmp.ge.s32.totalorder %s3738_s18, 2  ;;  %s2749_s28 = scalar_lea.sflag [#allocation5], %s2748_s9 }
 0x380   : > { %p3555_p3 = pnand %p4769_p13, %p4768_p10 }
 0x382   : > { %3721 = dma.done.wait (!%p3555_p3), %s2749_s28, 2048  }
 0x383   : > { %3723 = vsyncadd (!%p3555_p3), %s2749_s28, 4294965248  ;;  %p18_p7 = scmp.ge.s32.totalorder %s3830_s27, 4   ;;  %s4770_s15 = smov %s3730_s16 }
 0x384   : > { %s4771_s16 = smov %s3734_s17  ;;  %s4772_s17 = smov %s3864_s24 }
 0x385   : > { %s4773_s18 = smov %s3830_s27  ;;  %20 = sbr.rel (!%p18_p7) target bundleno = 6 (0x6), region = 93 }
 0x38c   :  { %2754 = vsyncpa [#allocation4], 1 }
 0x38d   :  { %2756 = vsyncpa [#allocation4 + $0x1], 1 }
 0x38e   :  { %2757 = vsyncpa [#allocation7], 1 }
 0x38f   :  { %2758 = vsyncpa [#allocation5], 1 }
 0x390   :  { %2760 = vsyncpa [#allocation5 + $0x1], 1 }

</bundles_post_ra>
